<compile_context>
chip_gen: v7x
topology: tpu7x:2x2x1
jax: 0.10.0
libtpu: 0.0.40
codegen_flags: <defaults>
</compile_context>

<pallas_src>
import functools

import jax
import jax.numpy as jnp
from jax.experimental import pallas as pl
from jax.experimental.pallas import tpu as pltpu

# ---- model hyper-parameters (from CNNModel.__init__) ----
C_IN = 6
C1, K1, S1 = 32, 6, 6          # conv1: 6 -> 32, kernel 6, stride 6
C2, K2, S2 = 64, 5, 2          # conv2: 32 -> 64, kernel 5, stride 2
CK1 = C_IN * K1                # 36 : width of one conv1 im2col row


def _out_len(length, k, s):
    return (length - k) // s + 1


def _round_up(a, m):
    return ((a + m - 1) // m) * m


def cnn_kernel(p1_ref, w1_ref, b1_ref, w2_ref, b2_ref, o_ref, y1_s,
               *, nb, tl, wlen, nblk, cdt, precision):
    """Fused conv1+ReLU+conv2+ReLU for `nb` batch elements x `tl` output rows.

    p1_ref : (nb, L1p, 36)  conv1 im2col rows (whole per-batch slab), cdt
    w1_ref : (36, 32)       conv1 weight, cdt
    b1_ref : (1, 32)        conv1 bias, f32
    w2_ref : (5, 32, 64)    conv2 weight, tap-major, cdt
    b2_ref : (1, 64)        conv2 bias, f32
    o_ref  : (nb, 64, tl)   output, channel-major, f32
    y1_s   : (wlen, 32)     f32 scratch holding relu(conv1) for this window
    """
    if nblk == 1:
        start = 0                                   # whole slab per step
    else:
        # row-block j needs conv1 rows [2*tl*j, 2*tl*j + wlen)
        start = pl.multiple_of(pl.program_id(1) * (2 * tl), 256)

    w1 = w1_ref[...]
    b1 = b1_ref[...]
    w2 = w2_ref[...]
    b2 = b2_ref[...]

    for ib in range(nb):                            # static unroll (nb <= 16)
        # ---- conv1, computed once for every conv1 position this block needs
        win = p1_ref[ib, pl.ds(start, wlen), :]                    # (wlen, 36)
        y1 = jnp.dot(win, w1, preferred_element_type=jnp.float32,
                     precision=precision)
        y1_s[...] = jnp.maximum(y1 + b1, 0.0)                      # f32 scratch

        # ---- conv2: 5 stride-2 taps of conv1, accumulated in f32 on the MXU
        y2 = jnp.zeros((tl, C2), jnp.float32)
        for k in range(K2):
            tap = y1_s[pl.ds(k, tl, stride=2), :].astype(cdt)      # (tl, 32)
            y2 = y2 + jnp.dot(tap, w2[k],
                              preferred_element_type=jnp.float32,
                              precision=precision)
        y2 = jnp.maximum(y2 + b2, 0.0)                             # (tl, 64)
        # channel-major store -> output already in PyTorch's (B, C2, L2) layout
        o_ref[ib] = y2.T                                           # (64, tl)


def _choose_blocking(B, L2, *, target_rows=2048, nb_cap=16):
    """Pick (nb, tl, nblk): nb batch elems / grid step (nb | B), tl output rows
    per step, nblk row-blocks per batch element (tl % 128 == 0 when nblk > 1)."""
    M2 = B * L2
    want_split = M2 >= 256            # v7x: give both TensorCores work
    if B == 1:
        if not want_split:
            return 1, L2, 1
        tl = _round_up(min(max(pl.cdiv(L2, 2), 8), target_rows), 128)
        return 1, tl, pl.cdiv(L2, tl)
    if B <= 2 and L2 >= 2 * target_rows:
        tl = _round_up(target_rows, 128)
        return 1, tl, pl.cdiv(L2, tl)
    # common case: whole L2 per step, several batch elements per step
    nb0 = max(1, min(B, nb_cap, target_rows // max(L2, 1)))
    if want_split:
        nb0 = max(1, min(nb0, B // 2))          # guarantee >= 2 grid blocks
    nb = 1
    for d in range(nb0, 0, -1):
        if B % d == 0:                          # exact batch tiling: no padding
            nb = d
            break
    return nb, L2, 1


def cnn_forward(x, params, *, matmul_dtype=jnp.bfloat16, target_rows=2048):
    """Pallas implementation of CNNModel.forward.  x: (B, C_IN, L) float32."""
    w1, b1, w2, b2 = params
    B, cin, L = x.shape
    assert cin == C_IN
    L1 = _out_len(L, K1, S1)
    L2 = _out_len(L1, K2, S2)

    nb, tl, nblk = _choose_blocking(B, L2, target_rows=target_rows)
    L2p = nblk * tl
    wlen = _round_up(2 * tl + (K2 - S2), 8)        # conv1 rows needed per block
    L1p = max(L1, (nblk - 1) * 2 * tl + wlen)      # padded conv1 rows per batch

    use_f32 = matmul_dtype == jnp.float32
    precision = jax.lax.Precision.HIGHEST if use_f32 else None
    cdt = matmul_dtype

    # ---- host glue (cheap): conv1 im2col is a pure reshape (stride == kernel).
    # Cast to the matmul dtype BEFORE the relayout so it moves half the bytes.
    # The 2.5x-duplicated fused patches are never materialized in HBM.
    xd = x if use_f32 else x.astype(cdt)
    p1 = xd[:, :, : L1 * S1].reshape(B, C_IN, L1, K1)
    p1 = p1.transpose(0, 2, 1, 3).reshape(B, L1, CK1)            # (B, L1, 36)
    p1 = jnp.pad(p1, ((0, 0), (0, L1p - L1), (0, 0)))
    # NOTE: zero-padded p1 rows only feed padded output rows t >= L2, which are
    # sliced off below -- keep that slice if L2p > L2.

    w1m = w1.reshape(C1, CK1).T.astype(cdt)                      # (36, 32)
    b1r = b1.reshape(1, C1).astype(jnp.float32)
    w2t = w2.transpose(2, 1, 0).astype(cdt)                      # (5, 32, 64)
    b2r = b2.reshape(1, C2).astype(jnp.float32)

    # ---- explicit VMEM budget (v5e default scoped limit is only 16 MiB)
    itemsize = jnp.dtype(cdt).itemsize
    vmem_need = (2 * (nb * L1p * CK1 * itemsize + nb * C2 * tl * 4)
                 + 2 * (CK1 * C1 + K2 * C1 * C2) * itemsize
                 + 2 * (C1 + C2) * 4 + wlen * C1 * 4)
    vmem_limit = int(min(48 * 2**20, max(16 * 2**20, 2 * vmem_need)))

    kernel = functools.partial(cnn_kernel, nb=nb, tl=tl, wlen=wlen, nblk=nblk,
                               cdt=cdt, precision=precision)

    out = pl.pallas_call(
        kernel,
        out_shape=jax.ShapeDtypeStruct((B, C2, L2p), jnp.float32),
        grid_spec=pltpu.PrefetchScalarGridSpec(
            num_scalar_prefetch=0,
            grid=(B // nb, nblk),
            in_specs=[
                pl.BlockSpec((nb, L1p, CK1), lambda i, j: (i, 0, 0)),
                pl.BlockSpec((CK1, C1), lambda i, j: (0, 0)),
                pl.BlockSpec((1, C1), lambda i, j: (0, 0)),
                pl.BlockSpec((K2, C1, C2), lambda i, j: (0, 0, 0)),
                pl.BlockSpec((1, C2), lambda i, j: (0, 0)),
            ],
            out_specs=pl.BlockSpec((nb, C2, tl), lambda i, j: (i, 0, j)),
            scratch_shapes=[pltpu.VMEM((wlen, C1), jnp.float32)],
        ),
        compiler_params=pltpu.CompilerParams(
            dimension_semantics=("parallel", "parallel"),
            vmem_limit_bytes=vmem_limit,
        ),
    )(p1, w1m, b1r, w2t, b2r)

    # already (B, C2, L2p); only a slice if row padding was needed (nblk > 1)
    return out if L2p == L2 else out[:, :, :L2]


def reference_forward(x, params):
    """Pure-JAX reference matching PyTorch semantics (correctness check)."""
    w1, b1, w2, b2 = params
    dn = ("NCH", "OIH", "NCH")
    hi = jax.lax.Precision.HIGHEST
    y = jax.lax.conv_general_dilated(x, w1, (S1,), "VALID",
                                     dimension_numbers=dn, precision=hi)
    y = jnp.maximum(y + b1[None, :, None], 0.0)
    y = jax.lax.conv_general_dilated(y, w2, (S2,), "VALID",
                                     dimension_numbers=dn, precision=hi)
    y = jnp.maximum(y + b2[None, :, None], 0.0)
    return y


if __name__ == "__main__":
    key = jax.random.PRNGKey(0)
    kx, k1, k2, k3, k4 = jax.random.split(key, 5)

    # small shapes consistent with the module: batch=2, 6 channels, length=120
    B, L = 2, 120
    x = jax.random.normal(kx, (B, C_IN, L), dtype=jnp.float32)

    # deterministic parameter init (PyTorch Conv1d-style uniform bounds)
    bound1 = 1.0 / (C_IN * K1) ** 0.5
    bound2 = 1.0 / (C1 * K2) ** 0.5
    w1 = jax.random.uniform(k1, (C1, C_IN, K1), jnp.float32, -bound1, bound1)
    b1 = jax.random.uniform(k2, (C1,), jnp.float32, -bound1, bound1)
    w2 = jax.random.uniform(k3, (C2, C1, K2), jnp.float32, -bound2, bound2)
    b2 = jax.random.uniform(k4, (C2,), jnp.float32, -bound2, bound2)
    params = (w1, b1, w2, b2)

    ref = reference_forward(x, params)

    # exact f32 path (precision=HIGHEST in the kernel): tight check
    run_f32 = jax.jit(lambda xx: cnn_forward(xx, params, matmul_dtype=jnp.float32))
    out_f32 = jax.block_until_ready(run_f32(x))
    assert out_f32.shape == ref.shape, (out_f32.shape, ref.shape)
    err_f32 = float(jnp.max(jnp.abs(out_f32 - ref)))
    assert jnp.allclose(out_f32, ref, atol=1e-4, rtol=1e-4), err_f32

    # bf16-MXU fast path (default): looser tolerance for bf16 operand rounding
    run_bf16 = jax.jit(lambda xx: cnn_forward(xx, params))
    out_bf16 = jax.block_until_ready(run_bf16(x))
    err_bf16 = float(jnp.max(jnp.abs(out_bf16 - ref)))
    assert jnp.allclose(out_bf16, ref, atol=5e-2, rtol=5e-2), err_bf16

    print("KERNEL_OK")
</pallas_src>

<mosaic_0001>
module attributes {stable_mosaic.version = 11 : i64} {
  func.func @cnn_kernel(%arg0: i32, %arg1: i32, %arg2: memref<2x24x36xf32, #tpu.memory_space<vmem>>, %arg3: memref<36x32xf32, #tpu.memory_space<vmem>>, %arg4: memref<1x32xf32, #tpu.memory_space<vmem>>, %arg5: memref<5x32x64xf32, #tpu.memory_space<vmem>>, %arg6: memref<1x64xf32, #tpu.memory_space<vmem>>, %arg7: memref<2x64x8xf32, #tpu.memory_space<vmem>>, %arg8: memref<24x32xf32, #tpu.memory_space<vmem>>) attributes {dimension_semantics = [#tpu.dimension_semantics<parallel>, #tpu.dimension_semantics<parallel>], iteration_bounds = array<i64: 1, 1>, scalar_prefetch = 0 : i64, scratch_operands = 1 : i64, tpu.core_type = #tpu.core_type<tc>, window_params = [{transform_indices = @transform_0, window_bounds = array<i64: 2, 24, 36>}, {pipeline_mode = #tpu.pipeline_mode<synchronous>, transform_indices = @transform_1, window_bounds = array<i64: 36, 32>}, {pipeline_mode = #tpu.pipeline_mode<synchronous>, transform_indices = @transform_2, window_bounds = array<i64: 1, 32>}, {pipeline_mode = #tpu.pipeline_mode<synchronous>, transform_indices = @transform_3, window_bounds = array<i64: 5, 32, 64>}, {pipeline_mode = #tpu.pipeline_mode<synchronous>, transform_indices = @transform_4, window_bounds = array<i64: 1, 64>}, {transform_indices = @transform_5, window_bounds = array<i64: 2, 64, 8>}]} {
    %c0 = arith.constant 0 : index
    %c0_0 = arith.constant 0 : index
    %0 = vector.load %arg3[%c0, %c0_0] : memref<36x32xf32, #tpu.memory_space<vmem>>, vector<36x32xf32>
    %c0_1 = arith.constant 0 : index
    %c0_2 = arith.constant 0 : index
    %1 = vector.load %arg4[%c0_1, %c0_2] : memref<1x32xf32, #tpu.memory_space<vmem>>, vector<1x32xf32>
    %c0_3 = arith.constant 0 : index
    %c0_4 = arith.constant 0 : index
    %c0_5 = arith.constant 0 : index
    %2 = vector.load %arg5[%c0_3, %c0_4, %c0_5] : memref<5x32x64xf32, #tpu.memory_space<vmem>>, vector<5x32x64xf32>
    %c0_6 = arith.constant 0 : index
    %c0_7 = arith.constant 0 : index
    %3 = vector.load %arg6[%c0_6, %c0_7] : memref<1x64xf32, #tpu.memory_space<vmem>>, vector<1x64xf32>
    %c0_8 = arith.constant 0 : index
    %c0_9 = arith.constant 0 : index
    %c0_10 = arith.constant 0 : index
    %4 = vector.load %arg2[%c0_8, %c0_9, %c0_10] : memref<2x24x36xf32, #tpu.memory_space<vmem>>, vector<1x24x36xf32>
    %5 = vector.shape_cast %4 : vector<1x24x36xf32> to vector<24x36xf32>
    %cst = arith.constant dense<0.000000e+00> : vector<24x32xf32>
    %6 = tpu.matmul %5, %0, %cst {dimension_numbers = #tpu.dot_dimension_numbers<[1], [0], [0], [1], [0, 0, 1, 1], [], []>, precision = #tpu.contract_precision<fp32>} : vector<24x36xf32>, vector<36x32xf32>, vector<24x32xf32> -> vector<24x32xf32>
    %7 = vector.broadcast %1 : vector<1x32xf32> to vector<24x32xf32>
    %8 = arith.addf %6, %7 : vector<24x32xf32>
    %cst_11 = arith.constant 0.000000e+00 : f32
    %9 = vector.broadcast %cst_11 : f32 to vector<24x32xf32>
    %10 = arith.maximumf %8, %9 : vector<24x32xf32>
    %c0_12 = arith.constant 0 : index
    %c0_13 = arith.constant 0 : index
    %11 = vector.load %arg8[%c0_12, %c0_13] : memref<24x32xf32, #tpu.memory_space<vmem>>, vector<24x32xf32>
    tpu.vector_store %arg8[%c0_12, %c0_13], %10 {strides = array<i32>} : memref<24x32xf32, #tpu.memory_space<vmem>>, vector<24x32xf32>,
    %cst_14 = arith.constant 0.000000e+00 : f32
    %12 = vector.broadcast %cst_14 : f32 to vector<8x64xf32>
    %c0_15 = arith.constant 0 : index
    %c0_16 = arith.constant 0 : index
    %13 = tpu.strided_load %arg8[%c0_15, %c0_16] {strides = array<i32: 2, 1>} : memref<24x32xf32, #tpu.memory_space<vmem>>, vector<8x32xf32>
    %14 = vector.extract_strided_slice %2 {offsets = [0, 0, 0], sizes = [1, 32, 64], strides = [1, 1, 1]} : vector<5x32x64xf32> to vector<1x32x64xf32>
    %15 = vector.shape_cast %14 : vector<1x32x64xf32> to vector<32x64xf32>
    %cst_17 = arith.constant dense<0.000000e+00> : vector<8x64xf32>
    %16 = tpu.matmul %13, %15, %cst_17 {dimension_numbers = #tpu.dot_dimension_numbers<[1], [0], [0], [1], [0, 0, 1, 1], [], []>, precision = #tpu.contract_precision<fp32>} : vector<8x32xf32>, vector<32x64xf32>, vector<8x64xf32> -> vector<8x64xf32>
    %17 = arith.addf %12, %16 : vector<8x64xf32>
    %c1 = arith.constant 1 : index
    %c0_18 = arith.constant 0 : index
    %18 = tpu.strided_load %arg8[%c1, %c0_18] {strides = array<i32: 2, 1>} : memref<24x32xf32, #tpu.memory_space<vmem>>, vector<8x32xf32>
    %19 = vector.extract_strided_slice %2 {offsets = [1, 0, 0], sizes = [1, 32, 64], strides = [1, 1, 1]} : vector<5x32x64xf32> to vector<1x32x64xf32>
    %20 = vector.shape_cast %19 : vector<1x32x64xf32> to vector<32x64xf32>
    %cst_19 = arith.constant dense<0.000000e+00> : vector<8x64xf32>
    %21 = tpu.matmul %18, %20, %cst_19 {dimension_numbers = #tpu.dot_dimension_numbers<[1], [0], [0], [1], [0, 0, 1, 1], [], []>, precision = #tpu.contract_precision<fp32>} : vector<8x32xf32>, vector<32x64xf32>, vector<8x64xf32> -> vector<8x64xf32>
    %22 = arith.addf %17, %21 : vector<8x64xf32>
    %c2 = arith.constant 2 : index
    %c0_20 = arith.constant 0 : index
    %23 = tpu.strided_load %arg8[%c2, %c0_20] {strides = array<i32: 2, 1>} : memref<24x32xf32, #tpu.memory_space<vmem>>, vector<8x32xf32>
    %24 = vector.extract_strided_slice %2 {offsets = [2, 0, 0], sizes = [1, 32, 64], strides = [1, 1, 1]} : vector<5x32x64xf32> to vector<1x32x64xf32>
    %25 = vector.shape_cast %24 : vector<1x32x64xf32> to vector<32x64xf32>
    %cst_21 = arith.constant dense<0.000000e+00> : vector<8x64xf32>
    %26 = tpu.matmul %23, %25, %cst_21 {dimension_numbers = #tpu.dot_dimension_numbers<[1], [0], [0], [1], [0, 0, 1, 1], [], []>, precision = #tpu.contract_precision<fp32>} : vector<8x32xf32>, vector<32x64xf32>, vector<8x64xf32> -> vector<8x64xf32>
    %27 = arith.addf %22, %26 : vector<8x64xf32>
    %c3 = arith.constant 3 : index
    %c0_22 = arith.constant 0 : index
    %28 = tpu.strided_load %arg8[%c3, %c0_22] {strides = array<i32: 2, 1>} : memref<24x32xf32, #tpu.memory_space<vmem>>, vector<8x32xf32>
    %29 = vector.extract_strided_slice %2 {offsets = [3, 0, 0], sizes = [1, 32, 64], strides = [1, 1, 1]} : vector<5x32x64xf32> to vector<1x32x64xf32>
    %30 = vector.shape_cast %29 : vector<1x32x64xf32> to vector<32x64xf32>
    %cst_23 = arith.constant dense<0.000000e+00> : vector<8x64xf32>
    %31 = tpu.matmul %28, %30, %cst_23 {dimension_numbers = #tpu.dot_dimension_numbers<[1], [0], [0], [1], [0, 0, 1, 1], [], []>, precision = #tpu.contract_precision<fp32>} : vector<8x32xf32>, vector<32x64xf32>, vector<8x64xf32> -> vector<8x64xf32>
    %32 = arith.addf %27, %31 : vector<8x64xf32>
    %c4 = arith.constant 4 : index
    %c0_24 = arith.constant 0 : index
    %33 = tpu.strided_load %arg8[%c4, %c0_24] {strides = array<i32: 2, 1>} : memref<24x32xf32, #tpu.memory_space<vmem>>, vector<8x32xf32>
    %34 = vector.extract_strided_slice %2 {offsets = [4, 0, 0], sizes = [1, 32, 64], strides = [1, 1, 1]} : vector<5x32x64xf32> to vector<1x32x64xf32>
    %35 = vector.shape_cast %34 : vector<1x32x64xf32> to vector<32x64xf32>
    %cst_25 = arith.constant dense<0.000000e+00> : vector<8x64xf32>
    %36 = tpu.matmul %33, %35, %cst_25 {dimension_numbers = #tpu.dot_dimension_numbers<[1], [0], [0], [1], [0, 0, 1, 1], [], []>, precision = #tpu.contract_precision<fp32>} : vector<8x32xf32>, vector<32x64xf32>, vector<8x64xf32> -> vector<8x64xf32>
    %37 = arith.addf %32, %36 : vector<8x64xf32>
    %38 = vector.broadcast %3 : vector<1x64xf32> to vector<8x64xf32>
    %39 = arith.addf %37, %38 : vector<8x64xf32>
    %cst_26 = arith.constant 0.000000e+00 : f32
    %40 = vector.broadcast %cst_26 : f32 to vector<8x64xf32>
    %41 = arith.maximumf %39, %40 : vector<8x64xf32>
    %42 = tpu.transpose %41, [1, 0] : vector<8x64xf32> -> vector<64x8xf32>
    %c0_27 = arith.constant 0 : index
    %c0_28 = arith.constant 0 : index
    %c0_29 = arith.constant 0 : index
    %43 = vector.load %arg7[%c0_27, %c0_28, %c0_29] : memref<2x64x8xf32, #tpu.memory_space<vmem>>, vector<1x64x8xf32>
    %44 = vector.shape_cast %43 : vector<1x64x8xf32> to vector<64x8xf32>
    %45 = vector.shape_cast %42 : vector<64x8xf32> to vector<1x64x8xf32>
    tpu.vector_store %arg7[%c0_27, %c0_28, %c0_29], %45 {strides = array<i32>} : memref<2x64x8xf32, #tpu.memory_space<vmem>>, vector<1x64x8xf32>,
    %c1_30 = arith.constant 1 : index
    %c0_31 = arith.constant 0 : index
    %c0_32 = arith.constant 0 : index
    %46 = vector.load %arg2[%c1_30, %c0_31, %c0_32] : memref<2x24x36xf32, #tpu.memory_space<vmem>>, vector<1x24x36xf32>
    %47 = vector.shape_cast %46 : vector<1x24x36xf32> to vector<24x36xf32>
    %cst_33 = arith.constant dense<0.000000e+00> : vector<24x32xf32>
    %48 = tpu.matmul %47, %0, %cst_33 {dimension_numbers = #tpu.dot_dimension_numbers<[1], [0], [0], [1], [0, 0, 1, 1], [], []>, precision = #tpu.contract_precision<fp32>} : vector<24x36xf32>, vector<36x32xf32>, vector<24x32xf32> -> vector<24x32xf32>
    %49 = vector.broadcast %1 : vector<1x32xf32> to vector<24x32xf32>
    %50 = arith.addf %48, %49 : vector<24x32xf32>
    %cst_34 = arith.constant 0.000000e+00 : f32
    %51 = vector.broadcast %cst_34 : f32 to vector<24x32xf32>
    %52 = arith.maximumf %50, %51 : vector<24x32xf32>
    %c0_35 = arith.constant 0 : index
    %c0_36 = arith.constant 0 : index
    %53 = vector.load %arg8[%c0_35, %c0_36] : memref<24x32xf32, #tpu.memory_space<vmem>>, vector<24x32xf32>
    tpu.vector_store %arg8[%c0_35, %c0_36], %52 {strides = array<i32>} : memref<24x32xf32, #tpu.memory_space<vmem>>, vector<24x32xf32>,
    %cst_37 = arith.constant 0.000000e+00 : f32
    %54 = vector.broadcast %cst_37 : f32 to vector<8x64xf32>
    %c0_38 = arith.constant 0 : index
    %c0_39 = arith.constant 0 : index
    %55 = tpu.strided_load %arg8[%c0_38, %c0_39] {strides = array<i32: 2, 1>} : memref<24x32xf32, #tpu.memory_space<vmem>>, vector<8x32xf32>
    %56 = vector.extract_strided_slice %2 {offsets = [0, 0, 0], sizes = [1, 32, 64], strides = [1, 1, 1]} : vector<5x32x64xf32> to vector<1x32x64xf32>
    %57 = vector.shape_cast %56 : vector<1x32x64xf32> to vector<32x64xf32>
    %cst_40 = arith.constant dense<0.000000e+00> : vector<8x64xf32>
    %58 = tpu.matmul %55, %57, %cst_40 {dimension_numbers = #tpu.dot_dimension_numbers<[1], [0], [0], [1], [0, 0, 1, 1], [], []>, precision = #tpu.contract_precision<fp32>} : vector<8x32xf32>, vector<32x64xf32>, vector<8x64xf32> -> vector<8x64xf32>
    %59 = arith.addf %54, %58 : vector<8x64xf32>
    %c1_41 = arith.constant 1 : index
    %c0_42 = arith.constant 0 : index
    %60 = tpu.strided_load %arg8[%c1_41, %c0_42] {strides = array<i32: 2, 1>} : memref<24x32xf32, #tpu.memory_space<vmem>>, vector<8x32xf32>
    %61 = vector.extract_strided_slice %2 {offsets = [1, 0, 0], sizes = [1, 32, 64], strides = [1, 1, 1]} : vector<5x32x64xf32> to vector<1x32x64xf32>
    %62 = vector.shape_cast %61 : vector<1x32x64xf32> to vector<32x64xf32>
    %cst_43 = arith.constant dense<0.000000e+00> : vector<8x64xf32>
    %63 = tpu.matmul %60, %62, %cst_43 {dimension_numbers = #tpu.dot_dimension_numbers<[1], [0], [0], [1], [0, 0, 1, 1], [], []>, precision = #tpu.contract_precision<fp32>} : vector<8x32xf32>, vector<32x64xf32>, vector<8x64xf32> -> vector<8x64xf32>
    %64 = arith.addf %59, %63 : vector<8x64xf32>
    %c2_44 = arith.constant 2 : index
    %c0_45 = arith.constant 0 : index
    %65 = tpu.strided_load %arg8[%c2_44, %c0_45] {strides = array<i32: 2, 1>} : memref<24x32xf32, #tpu.memory_space<vmem>>, vector<8x32xf32>
    %66 = vector.extract_strided_slice %2 {offsets = [2, 0, 0], sizes = [1, 32, 64], strides = [1, 1, 1]} : vector<5x32x64xf32> to vector<1x32x64xf32>
    %67 = vector.shape_cast %66 : vector<1x32x64xf32> to vector<32x64xf32>
    %cst_46 = arith.constant dense<0.000000e+00> : vector<8x64xf32>
    %68 = tpu.matmul %65, %67, %cst_46 {dimension_numbers = #tpu.dot_dimension_numbers<[1], [0], [0], [1], [0, 0, 1, 1], [], []>, precision = #tpu.contract_precision<fp32>} : vector<8x32xf32>, vector<32x64xf32>, vector<8x64xf32> -> vector<8x64xf32>
    %69 = arith.addf %64, %68 : vector<8x64xf32>
    %c3_47 = arith.constant 3 : index
    %c0_48 = arith.constant 0 : index
    %70 = tpu.strided_load %arg8[%c3_47, %c0_48] {strides = array<i32: 2, 1>} : memref<24x32xf32, #tpu.memory_space<vmem>>, vector<8x32xf32>
    %71 = vector.extract_strided_slice %2 {offsets = [3, 0, 0], sizes = [1, 32, 64], strides = [1, 1, 1]} : vector<5x32x64xf32> to vector<1x32x64xf32>
    %72 = vector.shape_cast %71 : vector<1x32x64xf32> to vector<32x64xf32>
    %cst_49 = arith.constant dense<0.000000e+00> : vector<8x64xf32>
    %73 = tpu.matmul %70, %72, %cst_49 {dimension_numbers = #tpu.dot_dimension_numbers<[1], [0], [0], [1], [0, 0, 1, 1], [], []>, precision = #tpu.contract_precision<fp32>} : vector<8x32xf32>, vector<32x64xf32>, vector<8x64xf32> -> vector<8x64xf32>
    %74 = arith.addf %69, %73 : vector<8x64xf32>
    %c4_50 = arith.constant 4 : index
    %c0_51 = arith.constant 0 : index
    %75 = tpu.strided_load %arg8[%c4_50, %c0_51] {strides = array<i32: 2, 1>} : memref<24x32xf32, #tpu.memory_space<vmem>>, vector<8x32xf32>
    %76 = vector.extract_strided_slice %2 {offsets = [4, 0, 0], sizes = [1, 32, 64], strides = [1, 1, 1]} : vector<5x32x64xf32> to vector<1x32x64xf32>
    %77 = vector.shape_cast %76 : vector<1x32x64xf32> to vector<32x64xf32>
    %cst_52 = arith.constant dense<0.000000e+00> : vector<8x64xf32>
    %78 = tpu.matmul %75, %77, %cst_52 {dimension_numbers = #tpu.dot_dimension_numbers<[1], [0], [0], [1], [0, 0, 1, 1], [], []>, precision = #tpu.contract_precision<fp32>} : vector<8x32xf32>, vector<32x64xf32>, vector<8x64xf32> -> vector<8x64xf32>
    %79 = arith.addf %74, %78 : vector<8x64xf32>
    %80 = vector.broadcast %3 : vector<1x64xf32> to vector<8x64xf32>
    %81 = arith.addf %79, %80 : vector<8x64xf32>
    %cst_53 = arith.constant 0.000000e+00 : f32
    %82 = vector.broadcast %cst_53 : f32 to vector<8x64xf32>
    %83 = arith.maximumf %81, %82 : vector<8x64xf32>
    %84 = tpu.transpose %83, [1, 0] : vector<8x64xf32> -> vector<64x8xf32>
    %c1_54 = arith.constant 1 : index
    %c0_55 = arith.constant 0 : index
    %c0_56 = arith.constant 0 : index
    %85 = vector.load %arg7[%c1_54, %c0_55, %c0_56] : memref<2x64x8xf32, #tpu.memory_space<vmem>>, vector<1x64x8xf32>
    %86 = vector.shape_cast %85 : vector<1x64x8xf32> to vector<64x8xf32>
    %87 = vector.shape_cast %84 : vector<64x8xf32> to vector<1x64x8xf32>
    tpu.vector_store %arg7[%c1_54, %c0_55, %c0_56], %87 {strides = array<i32>} : memref<2x64x8xf32, #tpu.memory_space<vmem>>, vector<1x64x8xf32>,
    return
  }
  func.func @transform_0(%arg0: i32, %arg1: i32) -> (i32, i32, i32) {
    %c0_i32 = arith.constant 0 : i32
    %c0_i32_0 = arith.constant 0 : i32
    %c0_i32_1 = arith.constant 0 : i32
    return %arg0, %c0_i32, %c0_i32_0 : i32, i32, i32
  }
  func.func @transform_1(%arg0: i32, %arg1: i32) -> (i32, i32) {
    %c0_i32 = arith.constant 0 : i32
    %c0_i32_0 = arith.constant 0 : i32
    %c0_i32_1 = arith.constant 0 : i32
    return %c0_i32, %c0_i32_0 : i32, i32
  }
  func.func @transform_2(%arg0: i32, %arg1: i32) -> (i32, i32) {
    %c0_i32 = arith.constant 0 : i32
    %c0_i32_0 = arith.constant 0 : i32
    %c0_i32_1 = arith.constant 0 : i32
    return %c0_i32, %c0_i32_0 : i32, i32
  }
  func.func @transform_3(%arg0: i32, %arg1: i32) -> (i32, i32, i32) {
    %c0_i32 = arith.constant 0 : i32
    %c0_i32_0 = arith.constant 0 : i32
    %c0_i32_1 = arith.constant 0 : i32
    %c0_i32_2 = arith.constant 0 : i32
    return %c0_i32, %c0_i32_0, %c0_i32_1 : i32, i32, i32
  }
  func.func @transform_4(%arg0: i32, %arg1: i32) -> (i32, i32) {
    %c0_i32 = arith.constant 0 : i32
    %c0_i32_0 = arith.constant 0 : i32
    %c0_i32_1 = arith.constant 0 : i32
    return %c0_i32, %c0_i32_0 : i32, i32
  }
  func.func @transform_5(%arg0: i32, %arg1: i32) -> (i32, i32, i32) {
    %c0_i32 = arith.constant 0 : i32
    %c0_i32_0 = arith.constant 0 : i32
    return %arg0, %c0_i32, %arg1 : i32, i32, i32
  }
}

</mosaic_0001>

<bundles_post_ra>
// kernel: _lambda_.1
= control target key start
LH: loop header
LB: loop body
LE: loop exit
PB: predicated region body
PF: predicated region fallthrough
CT: control target
= control target key end

     0   :  { %vm66_vm0 = vcmask 1043456   ;;  %v9410_v0 = vmov 0.0|0.0   ;;  %vm8059_vm1 = vmmov 0   ;;  %v9412_v4 = vmov 0.0   ;;  %s9397_s1 = inlined_call_operand.vmem [shape: f32[36,32], index: 1, kind: input, shape index: {}]   ;;  %s9398_s0 = inlined_call_operand.vmem [shape: f32[2,24,36], index: 0, kind: input, shape index: {}]   ;;  %s9399_s3 = inlined_call_operand.vmem [shape: f32[5,32,64], index: 3, kind: input, shape index: {}]   ;;  %s9400_s2 = inlined_call_operand.vmem [shape: f32[1,32], index: 2, kind: input, shape index: {}]   ;;  %s9401_s4 = inlined_call_operand.vmem [shape: f32[1,64], index: 4, kind: input, shape index: {}]   ;;  %s9402_s5 = inlined_call_operand.vmem [shape: f32[2,64,8], index: 5, kind: output, shape index: {}]  }
   0x1   :  { %7557 = vmatprep.subr.bf16.mxu0 %v9410_v0  ;;  %v20_v1 = vld [vmem:[%s9397_s1] sm:$0xff]  ;;  %v21_v2 = vld [vmem:[%s9397_s1 + $0x8] sm:$0xff]  ;;  %v22_v3 = vld [vmem:[%s9397_s1 + $0x10] sm:$0xff]  ;;  %6679 = vmatprep.mubr.msk.f32.mxu0 %vm8059_vm1, %v9412_v4  ;;  %vm56_vm2 = vcmask 293888   ;;  %vm657_vm3 = vcmask 261120   ;;  %vm3153_vm4 = vcmask 64512  }
   0x2   :  { %v71_v5 = vand.u32 4294901760, %v20_v1  ;;  %v74_v6 = vand.u32 4294901760, %v21_v2  ;;  %v23_v7 = vld [vmem:[%s9397_s1 + $0x18] sm:$0xff]  ;;  %v77_v8 = vand.u32 4294901760, %v22_v3  ;;  %v24_v9 = vld [vmem:[%s9397_s1 + $0x20] sm:$0xf]  ;;  %7593 = vmatprep.subr.bf16.mxu1 %v9410_v0  ;;  %6791 = vmatprep.mubr.msk.f32.mxu1 %vm8059_vm1, %v9412_v4 }
   0x3   :  { %v80_v10 = vand.u32 4294901760, %v23_v7  ;;  %v68_v11 = vsel %vm66_vm0, %v24_v9, 0  ;;  %v47_v12 = vld [vmem:[%s9398_s0] sm:$0xff]  ;;  %v48_v13 = vld [vmem:[%s9398_s0 + $0x8] sm:$0xff]  ;;  %v49_v18 = vld [vmem:[%s9398_s0 + $0x10] sm:$0xff] }
   0x4   :  { %v8119_v14 = vpack.c.bf16 %v74_v6, %v71_v5  ;;  %v8121_v15 = vand.u32 4294901760, %v68_v11  ;;  %v58_v16 = vsel %vm56_vm2, %v47_v12, 0  ;;  %v8124_v17 = vsub.f32 %v20_v1, %v71_v5  ;;  %v26_v62 = vld [vmem:[%s9399_s3] sm:$0xff]  ;;  %v27_v63 = vld [vmem:[%s9399_s3 + $0x8] sm:$0xff] }
   0x5   :  { %v8129_v19 = vpack.c.bf16 %v80_v10, %v77_v8  ;;  %v8131_v20 = vand.u32 4294901760, %v58_v16  ;;  %v8133_v21 = vsub.f32 %v21_v2, %v74_v6  ;;  %v61_v22 = vsel %vm56_vm2, %v48_v13, 0  ;;  %v28_v6 = vld [vmem:[%s9399_s3 + $0x10] sm:$0xff] }
   0x6   :  { %7559 = vmatpush3.bf16.msra.mxu0 %v8119_v14  ;;  %v173_v23 = vand.u32 4294901760, %v8124_v17  ;;  %v8138_v24 = vand.u32 4294901760, %v61_v22  ;;  %v8140_v25 = vsub.f32 %v22_v3, %v77_v8  ;;  %v8142_v26 = vsub.f32 %v23_v7, %v80_v10  ;;  %v29_v7 = vld [vmem:[%s9399_s3 + $0x18] sm:$0xff] }
   0x7   :  { %7560 = vmatprep.subr.bf16.mxu0 %v9410_v0  ;;  %v8146_v27 = vsub.f32 %v58_v16, %v8131_v20  ;;  %v180_v28 = vand.u32 4294901760, %v8133_v21  ;;  %v64_v29 = vsel %vm56_vm2, %v49_v18, 0  ;;  %v8151_v30 = vsub.f32 %v68_v11, %v8121_v15 }
   0x8   :  { %v174_v31 = vsub.f32 %v8124_v17, %v173_v23  ;;  %v8157_v32 = vsub.f32 %v61_v22, %v8138_v24  ;;  %v187_v33 = vand.u32 4294901760, %v8140_v25  ;;  %v194_v34 = vand.u32 4294901760, %v8142_v26 }
   0x9   :  { %9454 = vst [vmem:[#allocation3_spill] sm:$0xff] %v8151_v30  ;;  %v142_v35 = vand.u32 4294901760, %v8146_v27  ;;  %v181_v36 = vsub.f32 %v8133_v21, %v180_v28  ;;  %v8165_v37 = vand.u32 4294901760, %v64_v29  ;;  %v8186_v48 = vand.u32 4294901760, %v8151_v30 }
   0xa   :  { %7562 = vmatpush3.bf16.msra.mxu0 %v8129_v19  ;;  %v175_v38 = vand.u32 4294901760, %v174_v31  ;;  %v152_v39 = vand.u32 4294901760, %v8157_v32  ;;  %v188_v40 = vsub.f32 %v8140_v25, %v187_v33  ;;  %v195_v41 = vsub.f32 %v8142_v26, %v194_v34 }
   0xb   :  { %6677 = vmatprep.subr.mxu0 %v9412_v4  ;;  %v143_v42 = vsub.f32 %v8146_v27, %v142_v35  ;;  %v182_v43 = vand.u32 4294901760, %v181_v36  ;;  %v8180_v44 = vsub.f32 %v64_v29, %v8165_v37  ;;  %9455 = vst [vmem:[#allocation4_spill] sm:$0xff] %v8186_v48  ;;  %v202_v55 = vsub.f32 %v8151_v30, %v8186_v48  ;;  %v33_v29 = vld [vmem:[%s9399_s3 + $0x38] sm:$0xff] }
   0xc   :  { %v153_v45 = vsub.f32 %v8157_v32, %v152_v39  ;;  %v189_v46 = vand.u32 4294901760, %v188_v40  ;;  %v196_v47 = vand.u32 4294901760, %v195_v41  ;;  %v8213_v58 = vpack.c.bf16 %v8133_v21, %v8124_v17  ;;  %v31_v21 = vld [vmem:[%s9399_s3 + $0x28] sm:$0xff] }
   0xd   :  { %v144_v49 = vand.u32 4294901760, %v143_v42  ;;  %v8188_v50 = vpack.c.bf16 %v182_v43, %v175_v38  ;;  %v162_v51 = vand.u32 4294901760, %v8180_v44  ;;  %v8205_v57 = vand.u32 4294901760, %v202_v55 }
   0xe   :  { %6678 = vmatpush3.msra.mxu0 %v8121_v15  ;;  %v154_v52 = vand.u32 4294901760, %v153_v45  ;;  %v8197_v54 = vpack.c.bf16 %v196_v47, %v189_v46  ;;  %9457 = vst [vmem:[#allocation6_spill] sm:$0xff] %v8213_v58  ;;  %v8222_v59 = vpack.c.bf16 %v8142_v26, %v8140_v25  ;;  %v8253_v60 = vpack.c.bf16 %v180_v28, %v173_v23  ;;  %v32_v28 = vld [vmem:[%s9399_s3 + $0x30] sm:$0xff] }
   0xf   :  { %6680 = vmatmul.mubr.f32.vlgmr.msra.gmra.mrb[0].mxu0 %v144_v49  ;;  %7563 = vmatprep.subr.bf16.mxu0 %v9410_v0  ;;  %v163_v53 = vsub.f32 %v8180_v44, %v162_v51  ;;  %9456 = vst [vmem:[#allocation5_spill] sm:$0xff] %v8205_v57  ;;  %v8265_v61 = vpack.c.bf16 %v194_v34, %v187_v33  ;;  %v1156_v1 = vand.u32 4294901760, %v26_v62  ;;  %v1159_v2 = vand.u32 4294901760, %v27_v63 }
  0x10   :  { %7565 = vmatpush3.bf16.msra.mxu0 %v8188_v50  ;;  %6682 = vmatprep.mubr.msk.f32.mxu0 %vm8059_vm1, %v9412_v4  ;;  %9458 = vst [vmem:[#allocation7_spill] sm:$0xff] %v8222_v59  ;;  %9459 = vst [vmem:[#allocation8_spill] sm:$0xff] %v8253_v60  ;;  %v1162_v10 = vand.u32 4294901760, %v28_v6  ;;  %v1165_v11 = vand.u32 4294901760, %v29_v7  ;;  %v671_v23 = vand.u32 4294901760, %v31_v21  ;;  %v674_v31 = vand.u32 4294901760, %v32_v28 }
  0x11   :  { %7566 = vmatprep.subr.bf16.mxu0 %v9410_v0  ;;  %v164_v56 = vand.u32 4294901760, %v163_v53  ;;  %9460 = vst [vmem:[#allocation9_spill] sm:$0xff] %v8265_v61  ;;  %v8308_v3 = vsub.f32 %v26_v62, %v1156_v1  ;;  %v8310_v5 = vsub.f32 %v27_v63, %v1159_v2  ;;  %v8366_v62 = vpack.c.bf16 %v1159_v2, %v1156_v1  ;;  %v8381_v1 = vld [vmem:[%s9399_s3 + $0x40] sm:$0xff]  ;;  %v8386_v2 = vld [vmem:[%s9399_s3 + $0x48] sm:$0xff] }
  0x12   :  { %v8322_v13 = vsub.f32 %v28_v6, %v1162_v10  ;;  %v8324_v16 = vsub.f32 %v29_v7, %v1165_v11  ;;  %v762_v38 = vsub.f32 %v32_v28, %v674_v31  ;;  %v8368_v63 = vpack.c.bf16 %v1165_v11, %v1162_v10  ;;  %v8393_v10 = vld [vmem:[%s9399_s3 + $0x50] sm:$0xff]  ;;  %v8398_v11 = vld [vmem:[%s9399_s3 + $0x58] sm:$0xff] }
  0x13   :  { %6683 = vmatmul.mubr.f32.gmra.mrb[2].mxu0 %v154_v52  ;;  %v1237_v8 = vand.u32 4294901760, %v8308_v3  ;;  %v1244_v9 = vand.u32 4294901760, %v8310_v5 }
  0x14   :  { %7568 = vmatpush3.bf16.msra.mxu0 %v8197_v54  ;;  %6685 = vmatprep.mubr.msk.f32.mxu0 %vm8059_vm1, %v9412_v4  ;;  %v1251_v17 = vand.u32 4294901760, %v8322_v13  ;;  %v1258_v18 = vand.u32 4294901760, %v8324_v16  ;;  %v763_v42 = vand.u32 4294901760, %v762_v38 }
  0x15   :  { %6696 = vmatprep.subr.mxu0 %v9412_v4  ;;  %v8320_v12 = vpack.c.bf16 %v1244_v9, %v1237_v8  ;;  %v1238_v6 = vsub.f32 %v8308_v3, %v1237_v8  ;;  %v1245_v7 = vsub.f32 %v8310_v5, %v1244_v9  ;;  %v9420_v8 = vand.u32 4294901760, %v8381_v1 }
  0x16   :  { %v764_v45 = vsub.f32 %v762_v38, %v763_v42  ;;  %v9419_v9 = vand.u32 4294901760, %v8386_v2 }
  0x17   :  { %6686 = vmatmul.mubr.f32.gmra.mrb[4].mxu0 %v164_v56  ;;  %9461 = vst [vmem:[#allocation10_spill] sm:$0xff] %v8320_v12 }
  0x18   :  { %6697 = vmatpush3.msra.mxu0 %v8205_v57  ;;  %6698 = vmatprep.mubr.msk.f32.mxu0 %vm8059_vm1, %v9412_v4  ;;  %v765_v47 = vand.u32 4294901760, %v764_v45 }
  0x19   :  { %7569 = vmatprep.subr.bf16.mxu0 %v9410_v0 }
  0x1b   :  { %6699 = vmatmul.mubr.f32.vlgmr.msra.gmra.mrb[0].mxu0 %v8131_v20 }
  0x1c   :  { %7571 = vmatpush3.bf16.msra.mxu0 %v8213_v58  ;;  %6701 = vmatprep.mubr.msk.f32.mxu0 %vm8059_vm1, %v9412_v4 }
  0x1d   :  { %7572 = vmatprep.subr.bf16.mxu0 %v9410_v0 }
  0x1f   :  { %6702 = vmatmul.mubr.f32.gmra.mrb[2].mxu0 %v8138_v24 }
  0x20   :  { %7574 = vmatpush3.bf16.msra.mxu0 %v8222_v59  ;;  %6704 = vmatprep.mubr.msk.f32.mxu0 %vm8059_vm1, %v9412_v4 }
  0x21   :  { %6715 = vmatprep.subr.mxu0 %v9412_v4 }
  0x23   :  { %6705 = vmatmul.mubr.f32.gmra.mrb[4].mxu0 %v8165_v37 }
  0x24   :  { %6716 = vmatpush3.msra.mxu0 %v8151_v30  ;;  %6717 = vmatprep.mubr.msk.f32.mxu0 %vm8059_vm1, %v9412_v4 }
  0x25   :  { %7575 = vmatprep.subr.bf16.mxu0 %v9410_v0 }
  0x27   :  { %6718 = vmatmul.mubr.f32.vlgmr.msra.gmra.mrb[0].mxu0 %v8146_v27  ;;  %v755_v27 = vsub.f32 %v31_v21, %v671_v23  ;;  %v1246_v21 = vand.u32 4294901760, %v1245_v7 }
  0x28   :  { %7577 = vmatpush3.bf16.msra.mxu0 %v8119_v14  ;;  %6720 = vmatprep.mubr.msk.f32.mxu0 %vm8059_vm1, %v9412_v4 }
  0x29   :  { %7578 = vmatprep.subr.bf16.mxu0 %v9410_v0  ;;  %v756_v34 = vand.u32 4294901760, %v755_v27 }
  0x2b   :  { %6721 = vmatmul.mubr.f32.gmra.mrb[2].mxu0 %v8157_v32  ;;  %v677_v32 = vand.u32 4294901760, %v33_v29 }
  0x2c   :  { %7580 = vmatpush3.bf16.msra.mxu0 %v8129_v19  ;;  %6723 = vmatprep.mubr.msk.f32.mxu0 %vm8059_vm1, %v9412_v4 }
  0x2d   :  { %6734 = vmatprep.subr.mxu0 %v9412_v4 }
  0x2f   :  { %6724 = vmatmul.mubr.f32.gmra.mrb[4].mxu0 %v8180_v44 }
  0x30   :  { %6735 = vmatpush3.msra.mxu0 %v8121_v15  ;;  %6736 = vmatprep.mubr.msk.f32.mxu0 %vm8059_vm1, %v9412_v4 }
  0x31   :  { %7581 = vmatprep.subr.bf16.mxu0 %v9410_v0 }
  0x33   :  { %6737 = vmatmul.mubr.f32.vlgmr.msra.gmra.mrb[0].mxu0 %v142_v35  ;;  %v8350_v35 = vpack.c.bf16 %v677_v32, %v674_v31  ;;  %v9416_v31 = vand.u32 4294901760, %v8393_v10 }
  0x34   :  { %7583 = vmatpush3.bf16.msra.mxu0 %v8253_v60  ;;  %6739 = vmatprep.mubr.msk.f32.mxu0 %vm8059_vm1, %v9412_v4  ;;  %v9472_v60 = vmov 0.0|0.0  }
  0x35   :  { %7584 = vmatprep.subr.bf16.mxu0 %v9410_v0 }
  0x37   :  { %6740 = vmatmul.mubr.f32.gmra.mrb[2].mxu0 %v152_v39  ;;  %v769_v39 = vsub.f32 %v33_v29, %v677_v32  ;;  %v9414_v32 = vand.u32 4294901760, %v8398_v11 }
  0x38   :  { %7586 = vmatpush3.bf16.msra.mxu0 %v8265_v61  ;;  %6742 = vmatprep.mubr.msk.f32.mxu0 %vm8059_vm1, %v9412_v4 }
  0x39   :  { %6753 = vmatprep.subr.mxu0 %v9412_v4  ;;  %v770_v43 = vand.u32 4294901760, %v769_v39  ;;  %v8360_v53 = vpack.c.bf16 %v769_v39, %v762_v38 }
  0x3b   :  { %6743 = vmatmul.mubr.f32.gmra.mrb[4].mxu0 %v162_v51  ;;  %v771_v46 = vsub.f32 %v769_v39, %v770_v43  ;;  %v8364_v56 = vpack.c.bf16 %v770_v43, %v763_v42 }
  0x3c   :  { %6754 = vmatpush3.msra.mxu0 %v8186_v48  ;;  %6755 = vmatprep.mubr.msk.f32.mxu0 %vm8059_vm1, %v9412_v4  ;;  %v9471_v48 = vmov 0.0  }
  0x3d   :  { %7587 = vmatprep.subr.bf16.mxu0 %v9410_v0  ;;  %v772_v49 = vand.u32 4294901760, %v771_v46 }
  0x3f   :  { %6756 = vmatmul.mubr.f32.vlgmr.msra.gmra.mrb[0].mxu0 %v8131_v20  ;;  %v8356_v51 = vpack.c.bf16 %v772_v49, %v765_v47 }
  0x40   :  { %7589 = vmatpush3.bf16.msra.mxu0 %v8119_v14  ;;  %6758 = vmatprep.mubr.msk.f32.mxu0 %vm8059_vm1, %v9412_v4 }
  0x41   :  { %7590 = vmatprep.subr.bf16.mxu0 %v9410_v0 }
  0x43   :  { %6759 = vmatmul.mubr.f32.gmra.mrb[2].mxu0 %v8138_v24 }
  0x44   :  { %7592 = vmatpush3.bf16.msra.mxu0 %v8129_v19  ;;  %6761 = vmatprep.mubr.msk.f32.mxu0 %vm8059_vm1, %v9412_v4 }
  0x45   :  { %6772 = vmatprep.subr.mxu0 %v9412_v4 }
  0x47   :  { %6762 = vmatmul.mubr.f32.gmra.mrb[4].mxu0 %v8165_v37 }
  0x48   :  { %6773 = vmatpush3.msra.mxu0 %v8121_v15  ;;  %6774 = vmatprep.mubr.msk.f32.mxu0 %vm8059_vm1, %v9412_v4 }
  0x49   :  { %7653 = vmatprep.subr.bf16.mxu0 %v9410_v0 }
  0x4b   :  { %6775 = vmatmul.mubr.f32.vlgmr.msra.gmra.mrb[0].mxu0 %v8131_v20  ;;  %v30_v20 = vld [vmem:[%s9399_s3 + $0x20] sm:$0xff] }
  0x4c   :  { %6777 = vmatprep.mubr.msk.f32.mxu0 %vm8059_vm1, %v9412_v4  ;;  %7655 = vmatpush3.bf16.msra.mxu0 %v8320_v12  ;;  %v668_v22 = vand.u32 4294901760, %v30_v20 }
  0x4d   :  { %7656 = vmatprep.subr.bf16.mxu0 %v9410_v0 }
  0x4e   :  { %v8338_v25 = vpack.c.bf16 %v671_v23, %v668_v22  ;;  %v748_v26 = vsub.f32 %v30_v20, %v668_v22  ;;  %v1239_v20 = vand.u32 4294901760, %v1238_v6  ;;  %v1252_v23 = vsub.f32 %v8322_v13, %v1251_v17 }
  0x4f   :  { %6778 = vmatmul.mubr.f32.gmra.mrb[2].mxu0 %v8138_v24  ;;  %v8336_v24 = vpack.c.bf16 %v1258_v18, %v1251_v17  ;;  %v8403_v17 = vsub.f32 %v8381_v1, %v9420_v8 }
  0x50   :  { %6780 = vmatprep.mubr.msk.f32.mxu0 %vm8059_vm1, %v9412_v4  ;;  %7595 = vmatpush3.bf16.msra.mxu1 %v8338_v25  ;;  %v749_v33 = vand.u32 4294901760, %v748_v26  ;;  %v8358_v52 = vpack.c.bf16 %v755_v27, %v748_v26  ;;  %v8372_v22 = vpack.c.bf16 %v1246_v21, %v1239_v20  ;;  %v8445_v20 = vld [vmem:[%s9399_s3 + $0x60] sm:$0xff]  ;;  %v8450_v21 = vld [vmem:[%s9399_s3 + $0x68] sm:$0xff] }
  0x51   :  { %9462 = vst [vmem:[#allocation11_spill] sm:$0xff] %v8336_v24  ;;  %7658 = vmatpush3.bf16.msra.mxu0 %v8336_v24  ;;  %7596 = vmatprep.subr.bf16.mxu1 %v9410_v0 }
  0x52   :  { %7665 = vmatprep.subr.bf16.mxu0 %v9410_v0  ;;  %v750_v36 = vsub.f32 %v748_v26, %v749_v33  ;;  %v8362_v55 = vpack.c.bf16 %v756_v34, %v749_v33  ;;  %v1259_v26 = vsub.f32 %v8324_v16, %v1258_v18  ;;  %v8408_v18 = vsub.f32 %v8386_v2, %v9419_v9 }
  0x53   :  { %6781 = vmatmul.mubr.f32.gmra.mrb[4].mxu0 %v8165_v37  ;;  %v757_v37 = vsub.f32 %v755_v27, %v756_v34  ;;  %v1253_v27 = vand.u32 4294901760, %v1252_v23  ;;  %v9408_v33 = vand.u32 4294901760, %v8403_v17  ;;  %v9404_v23 = vand.u32 4294901760, %v8445_v20 }
  0x54   :  { %6901 = vmatprep.mubr.msk.f32.mxu0 %vm8059_vm1, %v9412_v4  ;;  %7598 = vmatpush3.bf16.msra.mxu1 %v8350_v35  ;;  %v751_v40 = vand.u32 4294901760, %v750_v36  ;;  %v1260_v28 = vand.u32 4294901760, %v1259_v26  ;;  %v9407_v34 = vand.u32 4294901760, %v8408_v18  ;;  %v8417_v36 = vsub.f32 %v8393_v10, %v9416_v31 }
  0x55   :  { %7599 = vmatprep.subr.bf16.mxu1 %v9410_v0  ;;  %v758_v41 = vand.u32 4294901760, %v757_v37  ;;  %v8422_v37 = vsub.f32 %v8398_v11, %v9414_v32  ;;  %v1728_v38 = vsub.f32 %v8403_v17, %v9408_v33  ;;  %v9403_v26 = vand.u32 4294901760, %v8450_v21 }
  0x56   :  { %v8376_v29 = vpack.c.bf16 %v1260_v28, %v1253_v27  ;;  %v1735_v39 = vsub.f32 %v8408_v18, %v9407_v34  ;;  %v8457_v27 = vld [vmem:[%s9399_s3 + $0x70] sm:$0xff]  ;;  %v8462_v28 = vld [vmem:[%s9399_s3 + $0x78] sm:$0xff] }
  0x57   :  { %v8354_v44 = vpack.c.bf16 %v758_v41, %v751_v40  ;;  %v9406_v40 = vand.u32 4294901760, %v8417_v36  ;;  %v9405_v41 = vand.u32 4294901760, %v8422_v37  ;;  %v1729_v42 = vand.u32 4294901760, %v1728_v38 }
  0x58   :  { %v1736_v43 = vand.u32 4294901760, %v1735_v39  ;;  %v8467_v38 = vsub.f32 %v8445_v20, %v9404_v23  ;;  %v8472_v39 = vsub.f32 %v8450_v21, %v9403_v26 }
  0x59   :  { %v1742_v46 = vsub.f32 %v8417_v36, %v9406_v40  ;;  %v1749_v47 = vsub.f32 %v8422_v37, %v9405_v41 }
  0x5a   :  { %v8432_v45 = vpack.c.bf16 %v1736_v43, %v1729_v42  ;;  %v9409_v42 = vand.u32 4294901760, %v8457_v27  ;;  %v9415_v43 = vand.u32 4294901760, %v8462_v28 }
  0x5b   :  { %v1743_v49 = vand.u32 4294901760, %v1742_v46  ;;  %v1750_v6 = vand.u32 4294901760, %v1749_v47  ;;  %v9417_v46 = vand.u32 4294901760, %v8467_v38  ;;  %v9418_v47 = vand.u32 4294901760, %v8472_v39 }
  0x5c   :  { %v8491_v26 = vsub.f32 %v8462_v28, %v9415_v43 }
  0x5d   :  { %v8440_v7 = vpack.c.bf16 %v1750_v6, %v1743_v49  ;;  %v8481_v49 = vld [vmem:[%s9400_s2] ss:$0 sm:$0xff]  ;;  %v8486_v6 = vsub.f32 %v8457_v27, %v9409_v42  ;;  %v2219_v23 = vsub.f32 %v8467_v38, %v9417_v46  ;;  %v2226_v41 = vsub.f32 %v8472_v39, %v9418_v47 }
  0x5e   :  { %9463 = vst [vmem:[#allocation12_spill] sm:$0xff] %v8481_v49  ;;  %v9423_v0 = vand.u32 4294901760, %v8491_v26 }
  0x5f   :  { %v9421_v34 = vand.u32 4294901760, %v8486_v6  ;;  %v2220_v4 = vand.u32 4294901760, %v2219_v23  ;;  %v2227_v32 = vand.u32 4294901760, %v2226_v41 }
  0x60   :  { %v2240_v47 = vsub.f32 %v8491_v26, %v9423_v0  ;;  %v9470_v0 = vand.u32 4294901760, %v8398_v11 }
  0x61   :  { %v8502_v31 = vpack.c.bf16 %v2227_v32, %v2220_v4  ;;  %v2233_v46 = vsub.f32 %v8486_v6, %v9421_v34 }
  0x62   :  { %v2241_v41 = vand.u32 4294901760, %v2240_v47  ;;  %v9466_v47 = vand.u32 4294901760, %v8381_v1 }
  0x63   :  { %9464 = vst [vmem:[#allocation13_spill] sm:$0xff] %v8502_v31  ;;  %v2234_v23 = vand.u32 4294901760, %v2233_v46 }
 0x11e   :  { %v638_v40 = vpop.f32.mrb[0].mxu0 }
 0x11f   :  { %v7989_v33 = vadd.f32 %v8481_v49, %v638_v40  ;;  %v6776_v42 = vpop.f32.mrb[1].mxu0 }
 0x121   :  { %v654_v43 = vmax.f32 %v7989_v33, 0.0  ;;  %v8512_v33 = vpack.c.bf16 %v2241_v41, %v2234_v23 }
 0x122   :  { %v644_v9 = vpop.f32.mrb[2].mxu0 }
 0x123   :  { %658 = vst.msk [vmem:[#allocation2] sm:$0xff] %vm657_vm3, %v654_v43  ;;  %v7990_v40 = vadd.f32 %v8481_v49, %v644_v9  ;;  %v6779_v42 = vpop.f32.mrb[3].mxu0  ;;  %9465 = vst [vmem:[#allocation14_spill] sm:$0xff] %v8512_v33  ;;  %v8520_v43 = vld [vmem:[%s9399_s3 + $0x80] sm:$0xff]  ;;  %v8525_v9 = vld [vmem:[%s9399_s3 + $0x88] sm:$0xff] }
 0x124   :  { %v9427_v23 = vand.u32 4294901760, %v8520_v43  ;;  %v9429_v41 = vand.u32 4294901760, %v8525_v9 }
 0x125   :  { %v655_v8 = vmax.f32 %v7990_v40, 0.0 }
 0x126   :  { %v650_v4 = vpop.f32.mrb[4].mxu0 }
 0x127   :  { %659 = vst.msk [vmem:[#allocation2 + $0x8] sm:$0xff] %vm657_vm3, %v655_v8  ;;  %v7991_v32 = vadd.f32 %v8481_v49, %v650_v4  ;;  %v6782_v34 = vpop.f32.mrb[5].mxu0  ;;  %v9467_v8 = vand.u32 4294901760, %v8386_v2  ;;  %v8542_v4 = vld [vmem:[%s9399_s3 + $0x90] sm:$0xff] }
 0x129   :  { %v656_v24 = vmax.f32 %v7991_v32, 0.0  ;;  %v8531_v40 = vpack.c.bf16 %v9467_v8, %v9466_v47  ;;  %v8552_v32 = vld [vmem:[%s9399_s3 + $0x98] sm:$0xff]  ;;  %v8562_v47 = vsub.f32 %v8525_v9, %v9429_v41 }
 0x12a   :  { %v9436_v61 = vand.u32 4294901760, %v8552_v32 }
 0x12b   :  { %660 = vst.msk [vmem:[#allocation2 + $0x10] sm:$0xff] %vm657_vm3, %v656_v24  ;;  %9468 = vst [vmem:[#allocation15_spill] sm:$0xff] %v8531_v40  ;;  %v9473_v33 = vand.u32 4294901760, %v8562_v47 }
 0x12e   :  { %v661_v46 = vld [vmem:[#allocation2] ss:$2 sm:$0xff]  ;;  %v663_v34 = vld [vmem:[#allocation2 + $0x1] ss:$2 sm:$0xff] }
 0x12f   :  { %v8534_v24 = vsel %vm657_vm3, %v661_v46, 0  ;;  %v665_v42 = vsel %vm657_vm3, %v663_v34, 0  ;;  %v8557_v46 = vsub.f32 %v8520_v43, %v9427_v23  ;;  %v9469_v34 = vand.u32 4294901760, %v8393_v10 }
 0x130   :  { %v8545_v1 = vand.u32 4294901760, %v8534_v24  ;;  %v8547_v2 = vand.u32 4294901760, %v665_v42  ;;  %v9435_v23 = vand.u32 4294901760, %v8542_v4 }
 0x131   :  { %v8572_v12 = vpack.c.bf16 %v9470_v0, %v9469_v34  ;;  %v2717_v0 = vsub.f32 %v8562_v47, %v9473_v33 }
 0x132   :  { %6902 = vmatmul.mubr.f32.vlgmr.msra.gmra.mrb[6].mxu0 %v8545_v1  ;;  %v8566_v8 = vsub.f32 %v665_v42, %v8547_v2  ;;  %v1641_v49 = vld [vmem:[#allocation2 + $0x2] ss:$2 sm:$0xff]  ;;  %v9441_v42 = vand.u32 4294901760, %v8557_v46  ;;  %v8589_v34 = vsub.f32 %v8542_v4, %v9435_v23 }
 0x133   :  { %7667 = vmatpush3.bf16.msra.mxu0 %v8531_v40  ;;  %6923 = vmatprep.mubr.msk.f32.mxu0 %vm8059_vm1, %v9471_v48  ;;  %v1643_v41 = vsel %vm657_vm3, %v1641_v49, 0  ;;  %v8594_v49 = vsub.f32 %v8552_v32, %v9436_v61  ;;  %v2718_v40 = vand.u32 4294901760, %v2717_v0 }
 0x134   :  { %7668 = vmatprep.subr.bf16.mxu0 %v9472_v60  ;;  %v8584_v11 = vand.u32 4294901760, %v1643_v41  ;;  %v2710_v10 = vsub.f32 %v8557_v46, %v9441_v42  ;;  %v9474_v31 = vand.u32 4294901760, %v8566_v8  ;;  %v2723_v61 = vand.u32 4294901760, %v8589_v34 }
 0x135   :  { %v9443_v59 = vand.u32 4294901760, %v8594_v49 }
 0x136   :  { %v739_v30 = vsub.f32 %v8566_v8, %v9474_v31  ;;  %v8606_v23 = vsub.f32 %v1643_v41, %v8584_v11  ;;  %v2711_v58 = vand.u32 4294901760, %v2710_v10  ;;  %v2724_v31 = vsub.f32 %v8589_v34, %v2723_v61 }
 0x137   :  { %7670 = vmatpush3.bf16.msra.mxu0 %v8572_v12  ;;  %v2731_v41 = vsub.f32 %v8594_v49, %v9443_v59 }
 0x138   :  { %v740_v42 = vand.u32 4294901760, %v739_v30  ;;  %7677 = vmatprep.subr.bf16.mxu0 %v9472_v60  ;;  %v9444_v33 = vand.u32 4294901760, %v8606_v23  ;;  %v8613_v57 = vpack.c.bf16 %v2718_v40, %v2711_v58  ;;  %v8627_v30 = vpack.c.bf16 %v8408_v18, %v8403_v17 }
 0x139   :  { %v2725_v58 = vand.u32 4294901760, %v2724_v31  ;;  %v2732_v40 = vand.u32 4294901760, %v2731_v41  ;;  %v9475_v41 = vand.u32 4294901760, %v8403_v17  ;;  %v9477_v17 = vand.u32 4294901760, %v8417_v36 }
 0x13a   :  { %6792 = vmatmul.mubr.f32.vlgmr.msra.gmra.mrb[0].mxu1 %v740_v42  ;;  %v1717_v10 = vsub.f32 %v8606_v23, %v9444_v33  ;;  %v2132_v42 = vld [vmem:[#allocation2 + $0x3] ss:$2 sm:$0xff]  ;;  %v8638_v33 = vpack.c.bf16 %v8422_v37, %v8417_v36  ;;  %v9479_v36 = vand.u32 4294901760, %v8445_v20  ;;  %v9481_v20 = vand.u32 4294901760, %v8457_v27 }
 0x13b   :  { %7601 = vmatpush3.bf16.msra.mxu1 %v8354_v44  ;;  %6802 = vmatprep.mubr.msk.f32.mxu1 %vm8059_vm1, %v9471_v48  ;;  %v8632_v59 = vpack.c.bf16 %v2732_v40, %v2725_v58  ;;  %v2134_v31 = vsel %vm657_vm3, %v2132_v42, 0  ;;  %v8712_v27 = vpack.c.bf16 %v8472_v39, %v8467_v38 }
 0x13c   :  { %7602 = vmatprep.subr.bf16.mxu1 %v9472_v60  ;;  %v1718_v0 = vand.u32 4294901760, %v1717_v10  ;;  %v9476_v10 = vand.u32 4294901760, %v8408_v18  ;;  %v8656_v40 = vand.u32 4294901760, %v2134_v31  ;;  %v9478_v18 = vand.u32 4294901760, %v8422_v37 }
 0x13d   :  { %v9480_v37 = vand.u32 4294901760, %v8450_v21  ;;  %v9482_v21 = vand.u32 4294901760, %v8462_v28  ;;  %9484 = vst [vmem:[#allocation16_spill] sm:$0xff] %v8712_v27 }
 0x13e   :  { %6924 = vmatmul.mubr.f32.vlgmr.msra.gmra.mrb[8].mxu0 %v1718_v0  ;;  %v8652_v58 = vpack.c.bf16 %v9476_v10, %v9475_v41  ;;  %v8667_v0 = vpack.c.bf16 %v9478_v18, %v9477_v17  ;;  %v8672_v42 = vsub.f32 %v2134_v31, %v8656_v40  ;;  %v9483_v18 = vand.u32 4294901760, %v8566_v8 }
 0x13f   :  { %7604 = vmatpush3.bf16.msra.mxu1 %v8356_v51  ;;  %7679 = vmatpush3.bf16.msra.mxu0 %v8627_v30  ;;  %v8683_v41 = vpack.c.bf16 %v9480_v37, %v9479_v36  ;;  %v8697_v10 = vpack.c.bf16 %v9482_v21, %v9481_v20  ;;  %v2623_v36 = vld [vmem:[#allocation2 + $0x4] ss:$2 sm:$0xff]  ;;  %v9486_v20 = vand.u32 4294901760, %v8467_v38  ;;  %v9487_v21 = vand.u32 4294901760, %v8472_v39 }
 0x140   :  { %7605 = vmatprep.subr.bf16.mxu1 %v9472_v60  ;;  %7680 = vmatprep.subr.bf16.mxu0 %v9472_v60  ;;  %v2207_v31 = vand.u32 4294901760, %v8672_v42  ;;  %v2625_v37 = vsel %vm657_vm3, %v2623_v36, 0  ;;  %v9489_v38 = vand.u32 4294901760, %v8486_v6  ;;  %v9490_v39 = vand.u32 4294901760, %v8491_v26 }
 0x141   :  { %6945 = vmatprep.mubr.msk.f32.mxu0 %vm8059_vm1, %v9471_v48 }
 0x142   :  { %6803 = vmatmul.mubr.f32.vlgmr.msra.gmra.mrb[2].mxu1 %v8547_v2  ;;  %v2208_v17 = vsub.f32 %v8672_v42, %v2207_v31  ;;  %v8755_v36 = vpack.c.bf16 %v9490_v39, %v9489_v38 }
 0x143   :  { %7607 = vmatpush3.bf16.msra.mxu1 %v8358_v52  ;;  %7682 = vmatpush3.bf16.msra.mxu0 %v8638_v33 }
 0x144   :  { %7608 = vmatprep.subr.bf16.mxu1 %v9472_v60  ;;  %7689 = vmatprep.subr.bf16.mxu0 %v9472_v60  ;;  %v2209_v28 = vand.u32 4294901760, %v2208_v17  ;;  %v8736_v17 = vpack.c.bf16 %v9487_v21, %v9486_v20  ;;  %9491 = vst [vmem:[#allocation19_spill] sm:$0xff] %v8755_v36 }
 0x145   :  { %6813 = vmatprep.mubr.msk.f32.mxu1 %vm8059_vm1, %v9471_v48 }
 0x146   :  { %6946 = vmatmul.mubr.f32.vlgmr.msra.gmra.mrb[10].mxu0 %v8606_v23  ;;  %9488 = vst [vmem:[#allocation18_spill] sm:$0xff] %v8736_v17 }
 0x147   :  { %7610 = vmatpush3.bf16.msra.mxu1 %v8360_v53  ;;  %7691 = vmatpush3.bf16.msra.mxu0 %v8652_v58 }
 0x148   :  { %7611 = vmatprep.subr.bf16.mxu1 %v9472_v60  ;;  %7692 = vmatprep.subr.bf16.mxu0 %v9472_v60 }
 0x149   :  { %6967 = vmatprep.mubr.msk.f32.mxu0 %vm8059_vm1, %v9471_v48 }
 0x14a   :  { %6814 = vmatmul.mubr.f32.vlgmr.msra.gmra.mrb[4].mxu1 %v8566_v8  ;;  %v8722_v8 = vpack.c.bf16 %v8491_v26, %v8486_v6  ;;  %v9492_v26 = vand.u32 4294901760, %v8520_v43  ;;  %v9493_v6 = vand.u32 4294901760, %v8525_v9  ;;  %v9494_v43 = vand.u32 4294901760, %v8542_v4 }
 0x14b   :  { %7613 = vmatpush3.bf16.msra.mxu1 %v8338_v25  ;;  %7694 = vmatpush3.bf16.msra.mxu0 %v8667_v0  ;;  %v9495_v9 = vand.u32 4294901760, %v8552_v32  ;;  %v8802_v4 = vpack.c.bf16 %v8562_v47, %v8557_v46 }
 0x14c   :  { %7614 = vmatprep.subr.bf16.mxu1 %v9472_v60  ;;  %7701 = vmatprep.subr.bf16.mxu0 %v9472_v60  ;;  %9485 = vst [vmem:[#allocation17_spill] sm:$0xff] %v8722_v8  ;;  %v8772_v21 = vpack.c.bf16 %v9493_v6, %v9492_v26  ;;  %v6262_v6 = vld [vmem:[%s9398_s0 + $0x18] sm:$0xff] }
 0x14d   :  { %6824 = vmatprep.mubr.msk.f32.mxu1 %vm8059_vm1, %v9471_v48  ;;  %v8789_v38 = vpack.c.bf16 %v9495_v9, %v9494_v43  ;;  %9496 = vst [vmem:[#allocation20_spill] sm:$0xff] %v8802_v4  ;;  %v8819_v43 = vpack.c.bf16 %v8594_v49, %v8589_v34  ;;  %v3167_v9 = vsel %vm56_vm2, %v6262_v6, 0 }
 0x14e   :  { %6968 = vmatmul.mubr.f32.vlgmr.msra.gmra.mrb[12].mxu0 %v8584_v11  ;;  %v8844_v6 = vand.u32 4294901760, %v3167_v9 }
 0x14f   :  { %7616 = vmatpush3.bf16.msra.mxu1 %v8350_v35  ;;  %7703 = vmatpush3.bf16.msra.mxu0 %v8683_v41  ;;  %9497 = vst [vmem:[#allocation21_spill] sm:$0xff] %v8819_v43 }
 0x150   :  { %7617 = vmatprep.subr.bf16.mxu1 %v9472_v60  ;;  %7704 = vmatprep.subr.bf16.mxu0 %v9472_v60 }
 0x151   :  { %6989 = vmatprep.mubr.msk.f32.mxu0 %vm8059_vm1, %v9471_v48 }
 0x152   :  { %6825 = vmatmul.mubr.f32.vlgmr.msra.gmra.mrb[6].mxu1 %v9483_v18  ;;  %v8742_v18 = vsub.f32 %v8534_v24, %v8545_v1 }
 0x153   :  { %7619 = vmatpush3.bf16.msra.mxu1 %v8362_v55  ;;  %7706 = vmatpush3.bf16.msra.mxu0 %v8697_v10 }
 0x154   :  { %7620 = vmatprep.subr.bf16.mxu1 %v9472_v60  ;;  %7713 = vmatprep.subr.bf16.mxu0 %v9472_v60  ;;  %v1226_v24 = vand.u32 4294901760, %v8742_v18 }
 0x155   :  { %6835 = vmatprep.mubr.msk.f32.mxu1 %vm8059_vm1, %v9471_v48 }
 0x156   :  { %6990 = vmatmul.mubr.f32.vlgmr.msra.gmra.mrb[14].mxu0 %v2209_v28  ;;  %v8744_v28 = vand.u32 4294901760, %v2625_v37 }
 0x157   :  { %7622 = vmatpush3.bf16.msra.mxu1 %v8364_v56  ;;  %7715 = vmatpush3.bf16.msra.mxu0 %v8712_v27 }
 0x158   :  { %7623 = vmatprep.subr.bf16.mxu1 %v9472_v60  ;;  %7716 = vmatprep.subr.bf16.mxu0 %v9472_v60  ;;  %v8761_v20 = vsub.f32 %v2625_v37, %v8744_v28  ;;  %v1227_v37 = vsub.f32 %v8742_v18, %v1226_v24 }
 0x159   :  { %7011 = vmatprep.mubr.msk.f32.mxu0 %vm8059_vm1, %v9471_v48 }
 0x15a   :  { %6836 = vmatmul.mubr.f32.vlgmr.msra.gmra.mrb[8].mxu1 %v8547_v2  ;;  %v1228_v39 = vand.u32 4294901760, %v1227_v37  ;;  %v8815_v37 = vpack.c.bf16 %v8310_v5, %v8308_v3  ;;  %v6263_v3 = vld [vmem:[%s9398_s0 + $0x20] sm:$0xff]  ;;  %v8834_v5 = vpack.c.bf16 %v8324_v16, %v8322_v13  ;;  %v6264_v13 = vld [vmem:[%s9398_s0 + $0x28] sm:$0xff]  ;;  %v9501_v16 = vand.u32 4294901760, %v8594_v49 }
 0x15b   :  { %7625 = vmatpush3.bf16.msra.mxu1 %v8338_v25  ;;  %7718 = vmatpush3.bf16.msra.mxu0 %v8722_v8 }
 0x15c   :  { %7626 = vmatprep.subr.bf16.mxu1 %v9472_v60  ;;  %7725 = vmatprep.subr.bf16.mxu0 %v9472_v60 }
 0x15d   :  { %6846 = vmatprep.mubr.msk.f32.mxu1 %vm8059_vm1, %v9471_v48 }
 0x15e   :  { %7012 = vmatmul.mubr.f32.vlgmr.msra.gmra.mrb[16].mxu0 %v8672_v42 }
 0x15f   :  { %7628 = vmatpush3.bf16.msra.mxu1 %v8350_v35  ;;  %7727 = vmatpush3.bf16.msra.mxu0 %v8736_v17 }
 0x160   :  { %7629 = vmatprep.subr.bf16.mxu1 %v9472_v60  ;;  %7728 = vmatprep.subr.bf16.mxu0 %v9472_v60 }
 0x161   :  { %7033 = vmatprep.mubr.msk.f32.mxu0 %vm8059_vm1, %v9471_v48 }
 0x162   :  { %6847 = vmatmul.mubr.f32.vlgmr.msra.gmra.mrb[10].mxu1 %v8547_v2  ;;  %v9445_v2 = vand.u32 4294901760, %v8761_v20 }
 0x163   :  { %7631 = vmatpush3.bf16.msra.mxu1 %v8366_v62  ;;  %7730 = vmatpush3.bf16.msra.mxu0 %v8755_v36 }
 0x164   :  { %7632 = vmatprep.subr.bf16.mxu1 %v9472_v60  ;;  %7737 = vmatprep.subr.bf16.mxu0 %v9472_v60  ;;  %v2699_v26 = vsub.f32 %v8761_v20, %v9445_v2  ;;  %v3170_v2 = vsel %vm56_vm2, %v6263_v3, 0 }
 0x165   :  { %6857 = vmatprep.mubr.msk.f32.mxu1 %vm8059_vm1, %v9471_v48  ;;  %v8866_v3 = vand.u32 4294901760, %v3170_v2 }
 0x166   :  { %7034 = vmatmul.mubr.f32.vlgmr.msra.gmra.mrb[18].mxu0 %v8656_v40  ;;  %v2700_v32 = vand.u32 4294901760, %v2699_v26  ;;  %v9499_v26 = vand.u32 4294901760, %v8562_v47  ;;  %v8864_v47 = vsub.f32 %v3167_v9, %v8844_v6 }
 0x167   :  { %7634 = vmatpush3.bf16.msra.mxu1 %v8368_v63  ;;  %7739 = vmatpush3.bf16.msra.mxu0 %v8772_v21  ;;  %v8878_v34 = vsub.f32 %v3170_v2, %v8866_v3 }
 0x168   :  { %7635 = vmatprep.subr.bf16.mxu1 %v9472_v60  ;;  %7740 = vmatprep.subr.bf16.mxu0 %v9472_v60 }
 0x169   :  { %7055 = vmatprep.mubr.msk.f32.mxu0 %vm8059_vm1, %v9471_v48  ;;  %v3257_v9 = vand.u32 4294901760, %v8878_v34 }
 0x16a   :  { %6858 = vmatmul.mubr.f32.vlgmr.msra.gmra.mrb[12].mxu1 %v1228_v39  ;;  %v9498_v39 = vand.u32 4294901760, %v8557_v46  ;;  %v8859_v46 = vpack.c.bf16 %v9501_v16, %v2723_v61  ;;  %v3247_v61 = vand.u32 4294901760, %v8864_v47 }
 0x16b   :  { %7637 = vmatpush3.bf16.msra.mxu1 %v8372_v22  ;;  %7742 = vmatpush3.bf16.msra.mxu0 %v8789_v38  ;;  %v3258_v16 = vsub.f32 %v8878_v34, %v3257_v9 }
 0x16c   :  { %7638 = vmatprep.subr.bf16.mxu1 %v9472_v60  ;;  %7749 = vmatprep.subr.bf16.mxu0 %v9472_v60  ;;  %9502 = vst [vmem:[#allocation23_spill] sm:$0xff] %v8859_v46  ;;  %v3248_v2 = vsub.f32 %v8864_v47, %v3247_v61 }
 0x16d   :  { %6868 = vmatprep.mubr.msk.f32.mxu1 %vm8059_vm1, %v9471_v48 }
 0x16e   :  { %7056 = vmatmul.mubr.f32.vlgmr.msra.gmra.mrb[20].mxu0 %v2700_v32  ;;  %v8840_v32 = vpack.c.bf16 %v9499_v26, %v9498_v39  ;;  %v3173_v39 = vsel %vm56_vm2, %v6264_v13, 0  ;;  %v3249_v13 = vand.u32 4294901760, %v3248_v2 }
 0x16f   :  { %7640 = vmatpush3.bf16.msra.mxu1 %v8376_v29  ;;  %7751 = vmatpush3.bf16.msra.mxu0 %v8802_v4  ;;  %v8880_v49 = vand.u32 4294901760, %v3173_v39 }
 0x170   :  { %7641 = vmatprep.subr.bf16.mxu1 %v9472_v60  ;;  %7752 = vmatprep.subr.bf16.mxu0 %v9472_v60  ;;  %9500 = vst [vmem:[#allocation22_spill] sm:$0xff] %v8840_v32 }
 0x171   :  { %7077 = vmatprep.mubr.msk.f32.mxu0 %vm8059_vm1, %v9471_v48  ;;  %v8894_v26 = vsub.f32 %v3173_v39, %v8880_v49 }
 0x172   :  { %6869 = vmatmul.mubr.f32.vlgmr.msra.gmra.mrb[14].mxu1 %v8545_v1 }
 0x173   :  { %7643 = vmatpush3.bf16.msra.mxu1 %v8815_v37  ;;  %7754 = vmatpush3.bf16.msra.mxu0 %v8819_v43  ;;  %v3267_v39 = vand.u32 4294901760, %v8894_v26 }
 0x174   :  { %7644 = vmatprep.subr.bf16.mxu1 %v9472_v60  ;;  %7761 = vmatprep.subr.bf16.mxu0 %v9472_v60 }
 0x175   :  { %6879 = vmatprep.mubr.msk.f32.mxu1 %vm8059_vm1, %v9471_v48 }
 0x176   :  { %7078 = vmatmul.mubr.f32.vlgmr.msra.gmra.mrb[22].mxu0 %v8761_v20 }
 0x177   :  { %7646 = vmatpush3.bf16.msra.mxu1 %v8834_v5  ;;  %7763 = vmatpush3.bf16.msra.mxu0 %v8840_v32 }
 0x178   :  { %7647 = vmatprep.subr.bf16.mxu1 %v9472_v60  ;;  %7764 = vmatprep.subr.bf16.mxu0 %v9472_v60 }
 0x179   :  { %7099 = vmatprep.mubr.msk.f32.mxu0 %vm8059_vm1, %v9471_v48 }
 0x17a   :  { %6880 = vmatmul.mubr.f32.vlgmr.msra.gmra.mrb[16].mxu1 %v8742_v18  ;;  %v3259_v18 = vand.u32 4294901760, %v3258_v16  ;;  %v9507_v16 = vand.u32 4294901760, %v8606_v23  ;;  %v9509_v23 = vld [vmem:[#allocation13_spill] sm:$0xff] }
 0x17b   :  { %7649 = vmatpush3.bf16.msra.mxu1 %v8366_v62  ;;  %7766 = vmatpush3.bf16.msra.mxu0 %v8859_v46 }
 0x17c   :  { %7650 = vmatprep.subr.bf16.mxu1 %v9472_v60  ;;  %7773 = vmatprep.subr.bf16.mxu0 %v9472_v60 }
 0x17d   :  { %6890 = vmatprep.mubr.msk.f32.mxu1 %vm8059_vm1, %v9471_v48 }
 0x17e   :  { %7100 = vmatmul.mubr.f32.vlgmr.msra.gmra.mrb[24].mxu0 %v8744_v28 }
 0x17f   :  { %7652 = vmatpush3.bf16.msra.mxu1 %v8368_v63  ;;  %7775 = vmatpush3.bf16.msra.mxu0 %v8119_v14 }
 0x180   :  { %7659 = vmatprep.subr.bf16.mxu1 %v9472_v60  ;;  %7776 = vmatprep.subr.bf16.mxu0 %v9472_v60 }
 0x181   :  { %7123 = vmatprep.mubr.msk.f32.mxu0 %vm8059_vm1, %v9471_v48 }
 0x182   :  { %6891 = vmatmul.mubr.f32.vlgmr.msra.gmra.mrb[18].mxu1 %v1226_v24  ;;  %v3268_v24 = vsub.f32 %v8894_v26, %v3267_v39 }
 0x183   :  { %7661 = vmatpush3.bf16.msra.mxu1 %v8366_v62  ;;  %7778 = vmatpush3.bf16.msra.mxu0 %v8129_v19 }
 0x184   :  { %7662 = vmatprep.subr.bf16.mxu1 %v9472_v60  ;;  %7121 = vmatprep.subr.mxu0 %v9471_v48  ;;  %v3269_v2 = vand.u32 4294901760, %v3268_v24  ;;  %v9510_v24 = vld [vmem:[#allocation14_spill] sm:$0xff] }
 0x185   :  { %6912 = vmatprep.mubr.msk.f32.mxu1 %vm8059_vm1, %v9471_v48 }
 0x187   :  { %7664 = vmatpush3.bf16.msra.mxu1 %v8368_v63  ;;  %7122 = vmatpush3.msra.mxu0 %v8121_v15 }
 0x188   :  { %7124 = vmatmul.mubr.f32.vlgmr.msra.gmra.mrb[26].mxu0 %v3249_v13  ;;  %7779 = vmatprep.subr.bf16.mxu0 %v9472_v60  ;;  %v9506_v13 = vld [vmem:[#allocation7_spill] sm:$0xff] }
 0x189   :  { %7781 = vmatpush3.bf16.msra.mxu0 %v8188_v50  ;;  %7671 = vmatprep.subr.bf16.mxu1 %v9472_v60  ;;  %v9503_v50 = vld [vmem:[#allocation5_spill] sm:$0xff] }
 0x18a   :  { %6913 = vmatmul.mubr.f32.vlgmr.msra.gmra.mrb[20].mxu1 %v8545_v1  ;;  %7126 = vmatprep.mubr.msk.f32.mxu0 %vm8059_vm1, %v9471_v48  ;;  %v9505_v1 = vld [vmem:[#allocation6_spill] sm:$0xff] }
 0x18b   :  { %7673 = vmatpush3.bf16.msra.mxu1 %v8432_v45  ;;  %7782 = vmatprep.subr.bf16.mxu0 %v9472_v60 }
 0x18c   :  { %7127 = vmatmul.mubr.f32.gmra.mrb[28].mxu0 %v3259_v18  ;;  %7674 = vmatprep.subr.bf16.mxu1 %v9472_v60  ;;  %v9508_v18 = vld [vmem:[#allocation3_spill] sm:$0xff] }
 0x18d   :  { %7784 = vmatpush3.bf16.msra.mxu0 %v8197_v54  ;;  %7129 = vmatprep.mubr.msk.f32.mxu0 %vm8059_vm1, %v9471_v48  ;;  %v9504_v54 = vld [vmem:[#allocation15_spill] sm:$0xff] }
 0x18e   :  { %7140 = vmatprep.subr.mxu0 %v9471_v48  ;;  %6934 = vmatprep.mubr.msk.f32.mxu1 %vm8059_vm1, %v9471_v48 }
 0x18f   :  { %7676 = vmatpush3.bf16.msra.mxu1 %v8440_v7 }
 0x190   :  { %7130 = vmatmul.mubr.f32.gmra.mrb[30].mxu0 %v3269_v2  ;;  %7683 = vmatprep.subr.bf16.mxu1 %v9472_v60  ;;  %v9512_v2 = vld [vmem:[#allocation9_spill] sm:$0xff] }
 0x191   :  { %7141 = vmatpush3.msra.mxu0 %v9503_v50  ;;  %7142 = vmatprep.mubr.msk.f32.mxu0 %vm8059_vm1, %v9471_v48 }
 0x192   :  { %6935 = vmatmul.mubr.f32.vlgmr.msra.gmra.mrb[22].mxu1 %v8584_v11  ;;  %7785 = vmatprep.subr.bf16.mxu0 %v9472_v60 }
 0x193   :  { %7685 = vmatpush3.bf16.msra.mxu1 %v9504_v54  ;;  %6956 = vmatprep.mubr.msk.f32.mxu1 %vm8059_vm1, %v9471_v48 }
 0x194   :  { %7143 = vmatmul.mubr.f32.vlgmr.msra.gmra.mrb[26].mxu0 %v8844_v6  ;;  %7686 = vmatprep.subr.bf16.mxu1 %v9472_v60 }
 0x195   :  { %7787 = vmatpush3.bf16.msra.mxu0 %v9505_v1  ;;  %7145 = vmatprep.mubr.msk.f32.mxu0 %vm8059_vm1, %v9471_v48 }
 0x196   :  { %7788 = vmatprep.subr.bf16.mxu0 %v9472_v60 }
 0x197   :  { %7688 = vmatpush3.bf16.msra.mxu1 %v8572_v12 }
 0x198   :  { %7146 = vmatmul.mubr.f32.gmra.mrb[28].mxu0 %v8866_v3  ;;  %7695 = vmatprep.subr.bf16.mxu1 %v9472_v60 }
 0x199   :  { %7790 = vmatpush3.bf16.msra.mxu0 %v9506_v13  ;;  %7148 = vmatprep.mubr.msk.f32.mxu0 %vm8059_vm1, %v9471_v48 }
 0x19a   :  { %6957 = vmatmul.mubr.f32.vlgmr.msra.gmra.mrb[24].mxu1 %v9507_v16  ;;  %7159 = vmatprep.subr.mxu0 %v9471_v48 }
 0x19b   :  { %7697 = vmatpush3.bf16.msra.mxu1 %v9504_v54  ;;  %6978 = vmatprep.mubr.msk.f32.mxu1 %vm8059_vm1, %v9471_v48 }
 0x19c   :  { %7149 = vmatmul.mubr.f32.gmra.mrb[30].mxu0 %v8880_v49  ;;  %7698 = vmatprep.subr.bf16.mxu1 %v9472_v60 }
 0x19d   :  { %7160 = vmatpush3.msra.mxu0 %v9508_v18  ;;  %7161 = vmatprep.mubr.msk.f32.mxu0 %vm8059_vm1, %v9471_v48 }
 0x19e   :  { %7791 = vmatprep.subr.bf16.mxu0 %v9472_v60 }
 0x19f   :  { %7700 = vmatpush3.bf16.msra.mxu1 %v8572_v12 }
 0x1a0   :  { %7162 = vmatmul.mubr.f32.vlgmr.msra.gmra.mrb[26].mxu0 %v8864_v47  ;;  %7707 = vmatprep.subr.bf16.mxu1 %v9472_v60  ;;  %v9513_v47 = vld [vmem:[#allocation4_spill] sm:$0xff] }
 0x1a1   :  { %7793 = vmatpush3.bf16.msra.mxu0 %v8119_v14  ;;  %7164 = vmatprep.mubr.msk.f32.mxu0 %vm8059_vm1, %v9471_v48 }
 0x1a2   :  { %6979 = vmatmul.mubr.f32.vlgmr.msra.gmra.mrb[26].mxu1 %v8584_v11  ;;  %7794 = vmatprep.subr.bf16.mxu0 %v9472_v60  ;;  %v9511_v11 = vld [vmem:[#allocation8_spill] sm:$0xff] }
 0x1a3   :  { %7709 = vmatpush3.bf16.msra.mxu1 %v9509_v23  ;;  %7000 = vmatprep.mubr.msk.f32.mxu1 %vm8059_vm1, %v9471_v48 }
 0x1a4   :  { %7165 = vmatmul.mubr.f32.gmra.mrb[28].mxu0 %v8878_v34  ;;  %7710 = vmatprep.subr.bf16.mxu1 %v9472_v60 }
 0x1a5   :  { %7796 = vmatpush3.bf16.msra.mxu0 %v8129_v19  ;;  %7167 = vmatprep.mubr.msk.f32.mxu0 %vm8059_vm1, %v9471_v48 }
 0x1a6   :  { %7178 = vmatprep.subr.mxu0 %v9471_v48 }
 0x1a7   :  { %7712 = vmatpush3.bf16.msra.mxu1 %v9510_v24 }
 0x1a8   :  { %7168 = vmatmul.mubr.f32.gmra.mrb[30].mxu0 %v8894_v26  ;;  %7719 = vmatprep.subr.bf16.mxu1 %v9472_v60 }
 0x1a9   :  { %7179 = vmatpush3.msra.mxu0 %v8121_v15  ;;  %7180 = vmatprep.mubr.msk.f32.mxu0 %vm8059_vm1, %v9471_v48 }
 0x1aa   :  { %7001 = vmatmul.mubr.f32.vlgmr.msra.gmra.mrb[28].mxu1 %v8656_v40  ;;  %7797 = vmatprep.subr.bf16.mxu0 %v9472_v60 }
 0x1ab   :  { %7721 = vmatpush3.bf16.msra.mxu1 %v8683_v41  ;;  %7022 = vmatprep.mubr.msk.f32.mxu1 %vm8059_vm1, %v9471_v48 }
 0x1ac   :  { %7181 = vmatmul.mubr.f32.vlgmr.msra.gmra.mrb[26].mxu0 %v3247_v61  ;;  %7722 = vmatprep.subr.bf16.mxu1 %v9472_v60 }
 0x1ad   :  { %7799 = vmatpush3.bf16.msra.mxu0 %v9511_v11  ;;  %7183 = vmatprep.mubr.msk.f32.mxu0 %vm8059_vm1, %v9471_v48 }
 0x1ae   :  { %7800 = vmatprep.subr.bf16.mxu0 %v9472_v60 }
 0x1af   :  { %7724 = vmatpush3.bf16.msra.mxu1 %v8697_v10 }
 0x1b0   :  { %7184 = vmatmul.mubr.f32.gmra.mrb[28].mxu0 %v3257_v9  ;;  %7731 = vmatprep.subr.bf16.mxu1 %v9472_v60 }
 0x1b1   :  { %7802 = vmatpush3.bf16.msra.mxu0 %v9512_v2  ;;  %7186 = vmatprep.mubr.msk.f32.mxu0 %vm8059_vm1, %v9471_v48 }
 0x1b2   :  { %7023 = vmatmul.mubr.f32.vlgmr.msra.gmra.mrb[30].mxu1 %v2207_v31  ;;  %7197 = vmatprep.subr.mxu0 %v9471_v48 }
 0x1b3   :  { %7733 = vmatpush3.bf16.msra.mxu1 %v8683_v41  ;;  %7044 = vmatprep.mubr.msk.f32.mxu1 %vm8059_vm1, %v9471_v48 }
 0x1b4   :  { %7187 = vmatmul.mubr.f32.gmra.mrb[30].mxu0 %v3267_v39  ;;  %7734 = vmatprep.subr.bf16.mxu1 %v9472_v60 }
 0x1b5   :  { %7198 = vmatpush3.msra.mxu0 %v9513_v47  ;;  %7199 = vmatprep.mubr.msk.f32.mxu0 %vm8059_vm1, %v9471_v48 }
 0x1b6   :  { %7803 = vmatprep.subr.bf16.mxu0 %v9472_v60 }
 0x1b7   :  { %7736 = vmatpush3.bf16.msra.mxu1 %v8697_v10 }
 0x1b8   :  { %7200 = vmatmul.mubr.f32.vlgmr.msra.gmra.mrb[26].mxu0 %v8844_v6  ;;  %7743 = vmatprep.subr.bf16.mxu1 %v9472_v60 }
 0x1b9   :  { %7805 = vmatpush3.bf16.msra.mxu0 %v8119_v14  ;;  %7202 = vmatprep.mubr.msk.f32.mxu0 %vm8059_vm1, %v9471_v48  ;;  %v9514_v14 = vand.u32 4294901760, %v8761_v20 }
 0x1ba   :  { %7045 = vmatmul.mubr.f32.vlgmr.msra.gmra.mrb[32].mxu1 %v8656_v40  ;;  %7806 = vmatprep.subr.bf16.mxu0 %v9472_v60 }
 0x1bb   :  { %7745 = vmatpush3.bf16.msra.mxu1 %v8613_v57  ;;  %7066 = vmatprep.mubr.msk.f32.mxu1 %vm8059_vm1, %v9471_v48 }
 0x1bc   :  { %7203 = vmatmul.mubr.f32.gmra.mrb[28].mxu0 %v8866_v3  ;;  %7746 = vmatprep.subr.bf16.mxu1 %v9472_v60 }
 0x1bd   :  { %7808 = vmatpush3.bf16.msra.mxu0 %v8129_v19  ;;  %7205 = vmatprep.mubr.msk.f32.mxu0 %vm8059_vm1, %v9471_v48 }
 0x1be   :  { %7216 = vmatprep.subr.mxu0 %v9471_v48 }
 0x1bf   :  { %7748 = vmatpush3.bf16.msra.mxu1 %v8632_v59 }
 0x1c0   :  { %7206 = vmatmul.mubr.f32.gmra.mrb[30].mxu0 %v8880_v49  ;;  %7755 = vmatprep.subr.bf16.mxu1 %v9472_v60 }
 0x1c1   :  { %7217 = vmatpush3.msra.mxu0 %v8121_v15  ;;  %7218 = vmatprep.mubr.msk.f32.mxu0 %vm8059_vm1, %v9471_v48 }
 0x1c2   :  { %7067 = vmatmul.mubr.f32.vlgmr.msra.gmra.mrb[34].mxu1 %v8744_v28  ;;  %7863 = vmatprep.subr.bf16.mxu0 %v9472_v60 }
 0x1c3   :  { %7757 = vmatpush3.bf16.msra.mxu1 %v8772_v21  ;;  %7088 = vmatprep.mubr.msk.f32.mxu1 %vm8059_vm1, %v9471_v48 }
 0x1c4   :  { %7219 = vmatmul.mubr.f32.vlgmr.msra.gmra.mrb[26].mxu0 %v8844_v6  ;;  %7758 = vmatprep.subr.bf16.mxu1 %v9472_v60 }
 0x1c5   :  { %7221 = vmatprep.mubr.msk.f32.mxu0 %vm8059_vm1, %v9471_v48  ;;  %7865 = vmatpush3.bf16.msra.mxu0 %v8366_v62 }
 0x1c6   :  { %7866 = vmatprep.subr.bf16.mxu0 %v9472_v60 }
 0x1c7   :  { %7760 = vmatpush3.bf16.msra.mxu1 %v8789_v38 }
 0x1c8   :  { %7222 = vmatmul.mubr.f32.gmra.mrb[28].mxu0 %v8866_v3  ;;  %7767 = vmatprep.subr.bf16.mxu1 %v9472_v60 }
 0x1c9   :  { %7224 = vmatprep.mubr.msk.f32.mxu0 %vm8059_vm1, %v9471_v48  ;;  %7868 = vmatpush3.bf16.msra.mxu0 %v8368_v63 }
 0x1ca   :  { %7089 = vmatmul.mubr.f32.vlgmr.msra.gmra.mrb[36].mxu1 %v9514_v14  ;;  %7875 = vmatprep.subr.bf16.mxu0 %v9472_v60 }
 0x1cb   :  { %7769 = vmatpush3.bf16.msra.mxu1 %v8772_v21  ;;  %7110 = vmatprep.mubr.msk.f32.mxu1 %vm8059_vm1, %v9471_v48 }
 0x1cc   :  { %7225 = vmatmul.mubr.f32.gmra.mrb[30].mxu0 %v8880_v49  ;;  %7770 = vmatprep.subr.bf16.mxu1 %v9472_v60 }
 0x1cd   :  { %7334 = vmatprep.mubr.msk.f32.mxu0 %vm8059_vm1, %v9471_v48 }
 0x1cf   :  { %7772 = vmatpush3.bf16.msra.mxu1 %v8789_v38 }
 0x1d0   :  { %7809 = vmatprep.subr.bf16.mxu1 %v9472_v60 }
 0x1d2   :  { %7111 = vmatmul.mubr.f32.vlgmr.msra.gmra.mrb[38].mxu1 %v8744_v28 }
 0x1d3   :  { %7811 = vmatpush3.bf16.msra.mxu1 %v8338_v25  ;;  %7235 = vmatprep.mubr.msk.f32.mxu1 %vm8059_vm1, %v9471_v48 }
 0x1d4   :  { %7812 = vmatprep.subr.bf16.mxu1 %v9472_v60 }
 0x1d7   :  { %7814 = vmatpush3.bf16.msra.mxu1 %v8350_v35 }
 0x1d8   :  { %7815 = vmatprep.subr.bf16.mxu1 %v9472_v60 }
 0x205   :  { %v1561_v15 = vpop.f32.mrb[6].mxu0 }
 0x206   :  { %v6903_v19 = vpop.f32.mrb[7].mxu0 }
 0x20d   :  { %v742_v40 = vpop.f32.mrb[0].mxu1 }
 0x20e   :  { %v6793_v42 = vpop.f32.mrb[1].mxu1 }
 0x211   :  { %v1720_v31 = vpop.f32.mrb[8].mxu0 }
 0x212   :  { %v6925_v20 = vpop.f32.mrb[9].mxu0 }
 0x215   :  { %v833_v6 = vpop.f32.mrb[2].mxu1 }
 0x216   :  { %v834_v3 = vadd.f32 %v833_v6, %v742_v40  ;;  %v6804_v28 = vpop.f32.mrb[3].mxu1 }
 0x219   :  { %v1891_v61 = vpop.f32.mrb[10].mxu0 }
 0x21a   :  { %v6947_v34 = vpop.f32.mrb[11].mxu0 }
 0x21d   :  { %v913_v49 = vpop.f32.mrb[4].mxu1 }
 0x21e   :  { %v914_v9 = vadd.f32 %v913_v49, %v834_v3  ;;  %v6815_v26 = vpop.f32.mrb[5].mxu1 }
 0x221   :  { %v2051_v39 = vpop.f32.mrb[12].mxu0 }
 0x222   :  { %v6969_v50 = vpop.f32.mrb[13].mxu0 }
 0x225   :  { %v990_v1 = vpop.f32.mrb[6].mxu1 }
 0x226   :  { %v991_v13 = vadd.f32 %v990_v1, %v914_v9  ;;  %v6826_v16 = vpop.f32.mrb[7].mxu1 }
 0x229   :  { %v2211_v18 = vpop.f32.mrb[14].mxu0 }
 0x22a   :  { %v6991_v11 = vpop.f32.mrb[15].mxu0 }
 0x22d   :  { %v1073_v2 = vpop.f32.mrb[8].mxu1 }
 0x22e   :  { %v1074_v47 = vadd.f32 %v1073_v2, %v991_v13  ;;  %v6837_v14 = vpop.f32.mrb[9].mxu1 }
 0x231   :  { %v2382_v19 = vpop.f32.mrb[16].mxu0 }
 0x232   :  { %v7013_v42 = vpop.f32.mrb[17].mxu0 }
 0x235   :  { %v1148_v20 = vpop.f32.mrb[10].mxu1 }
 0x236   :  { %v1149_v40 = vadd.f32 %v1148_v20, %v1074_v47  ;;  %v6848_v6 = vpop.f32.mrb[11].mxu1 }
 0x239   :  { %v2542_v28 = vpop.f32.mrb[18].mxu0 }
 0x23a   :  { %v7035_v34 = vpop.f32.mrb[19].mxu0 }
 0x23d   :  { %v1230_v46 = vpop.f32.mrb[12].mxu1 }
 0x23e   :  { %v1231_v3 = vadd.f32 %v1230_v46, %v1149_v40  ;;  %v6859_v49 = vpop.f32.mrb[13].mxu1 }
 0x241   :  { %v2702_v26 = vpop.f32.mrb[20].mxu0 }
 0x242   :  { %v7057_v50 = vpop.f32.mrb[21].mxu0 }
 0x245   :  { %v1321_v32 = vpop.f32.mrb[14].mxu1 }
 0x246   :  { %v1322_v9 = vadd.f32 %v1321_v32, %v1231_v3  ;;  %v6870_v1 = vpop.f32.mrb[15].mxu1 }
 0x249   :  { %v2873_v16 = vpop.f32.mrb[22].mxu0 }
 0x24a   :  { %v7079_v11 = vpop.f32.mrb[23].mxu0 }
 0x24d   :  { %v1401_v43 = vpop.f32.mrb[16].mxu1 }
 0x24e   :  { %v1402_v13 = vadd.f32 %v1401_v43, %v1322_v9  ;;  %v6881_v2 = vpop.f32.mrb[17].mxu1 }
 0x251   :  { %v3033_v14 = vpop.f32.mrb[24].mxu0 }
 0x252   :  { %v7101_v42 = vpop.f32.mrb[25].mxu0 }
 0x255   :  { %v1478_v4 = vpop.f32.mrb[18].mxu1 }
 0x256   :  { %v1479_v47 = vadd.f32 %v1478_v4, %v1402_v13  ;;  %v6892_v20 = vpop.f32.mrb[19].mxu1 }
 0x258   :  { %v1562_v6 = vadd.f32 %v1561_v15, %v1479_v47 }
 0x25d   :  { %v1636_v34 = vpop.f32.mrb[20].mxu1 }
 0x25e   :  { %v1637_v36 = vadd.f32 %v1636_v34, %v1562_v6  ;;  %v6914_v46 = vpop.f32.mrb[21].mxu1 }
 0x265   :  { %v1811_v40 = vpop.f32.mrb[22].mxu1 }
 0x266   :  { %v1812_v49 = vadd.f32 %v1811_v40, %v1720_v31  ;;  %v6936_v50 = vpop.f32.mrb[23].mxu1 }
 0x267   :  { %v9515_v50 = vld [vmem:[#allocation12_spill] sm:$0xff] }
 0x268   :  { %v1892_v17 = vadd.f32 %v1891_v61, %v1812_v49 }
 0x26d   :  { %v1968_v32 = vpop.f32.mrb[24].mxu1 }
 0x26e   :  { %v1969_v3 = vadd.f32 %v1968_v32, %v1892_v17  ;;  %v6958_v1 = vpop.f32.mrb[25].mxu1 }
 0x270   :  { %v2052_v11 = vadd.f32 %v2051_v39, %v1969_v3 }
 0x275   :  { %v2126_v8 = vpop.f32.mrb[26].mxu1 }
 0x276   :  { %v2127_v43 = vadd.f32 %v2126_v8, %v2052_v11  ;;  %v6980_v9 = vpop.f32.mrb[27].mxu1 }
 0x278   :  { %v2130_v2 = vadd.f32 %v2127_v43, %v1637_v36 }
 0x27d   :  { %v2302_v42 = vpop.f32.mrb[28].mxu1 }
 0x27e   :  { %v2303_v27 = vadd.f32 %v2302_v42, %v2211_v18  ;;  %v7002_v4 = vpop.f32.mrb[29].mxu1 }
 0x280   :  { %v2383_v13 = vadd.f32 %v2382_v19, %v2303_v27 }
 0x285   :  { %v2459_v15 = vpop.f32.mrb[30].mxu1 }
 0x286   :  { %v2460_v47 = vadd.f32 %v2459_v15, %v2383_v13  ;;  %v7024_v20 = vpop.f32.mrb[31].mxu1 }
 0x288   :  { %v2543_v6 = vadd.f32 %v2542_v28, %v2460_v47  ;;  %v9087_v47 = vld [vmem:[%s9401_s4] ss:$0 sm:$0xff] }
 0x28d   :  { %v2617_v34 = vpop.f32.mrb[32].mxu1 }
 0x28e   :  { %v2618_v31 = vadd.f32 %v2617_v34, %v2543_v6  ;;  %v7046_v46 = vpop.f32.mrb[33].mxu1 }
 0x290   :  { %v2621_v61 = vadd.f32 %v2618_v31, %v2130_v2 }
 0x295   :  { %v2793_v40 = vpop.f32.mrb[34].mxu1 }
 0x296   :  { %v2794_v17 = vadd.f32 %v2793_v40, %v2702_v26  ;;  %v7068_v49 = vpop.f32.mrb[35].mxu1 }
 0x297   :  { %v3743_v39 = vpop.f32.mrb[26].mxu0 }
 0x298   :  { %v7992_v8 = vadd.f32 %v9515_v50, %v3743_v39  ;;  %v7220_v32 = vpop.f32.mrb[27].mxu0  ;;  %v2874_v36 = vadd.f32 %v2873_v16, %v2794_v17 }
 0x29a   :  { %v3759_v3 = vmax.f32 %v7992_v8, 0.0 }
 0x29b   :  { %v3749_v18 = vpop.f32.mrb[28].mxu0 }
 0x29c   :  { %3762 = vst.msk [vmem:[#allocation2] sm:$0xff] %vm657_vm3, %v3759_v3  ;;  %v7993_v27 = vadd.f32 %v9515_v50, %v3749_v18  ;;  %v7223_v19 = vpop.f32.mrb[29].mxu0  ;;  %v9522_v18 = vld [vmem:[#allocation20_spill] sm:$0xff] }
 0x29d   :  { %v2950_v28 = vpop.f32.mrb[36].mxu1 }
 0x29e   :  { %v3760_v1 = vmax.f32 %v7993_v27, 0.0  ;;  %v2951_v11 = vadd.f32 %v2950_v28, %v2874_v36  ;;  %v7090_v43 = vpop.f32.mrb[37].mxu1  ;;  %v9524_v27 = vld [vmem:[#allocation22_spill] sm:$0xff] }
 0x29f   :  { %v3755_v9 = vpop.f32.mrb[30].mxu0 }
 0x2a0   :  { %3763 = vst.msk [vmem:[#allocation2 + $0x8] sm:$0xff] %vm657_vm3, %v3760_v1  ;;  %v7994_v26 = vadd.f32 %v9515_v50, %v3755_v9  ;;  %v7226_v2 = vpop.f32.mrb[31].mxu0  ;;  %v3034_v42 = vadd.f32 %v3033_v14, %v2951_v11 }
 0x2a2   :  { %v3761_v4 = vmax.f32 %v7994_v26, 0.0 }
 0x2a4   :  { %3764 = vst.msk [vmem:[#allocation2 + $0x10] sm:$0xff] %vm657_vm3, %v3761_v4 }
 0x2a5   :  { %v3108_v16 = vpop.f32.mrb[38].mxu1 }
 0x2a6   :  { %v3109_v13 = vadd.f32 %v3108_v16, %v3034_v42  ;;  %v7112_v15 = vpop.f32.mrb[39].mxu1 }
 0x2a7   :  { %v3765_v20 = vld [vmem:[#allocation2] ss:$2 sm:$0xff]  ;;  %v3766_v6 = vld [vmem:[#allocation2 + $0x1] ss:$2 sm:$0xff] }
 0x2a8   :  { %v3112_v34 = vadd.f32 %v3109_v13, %v2621_v61  ;;  %v4256_v31 = vsel %vm657_vm3, %v3765_v20, 0  ;;  %v3768_v46 = vsel %vm657_vm3, %v3766_v6, 0 }
 0x2a9   :  { %v9091_v40 = vand.u32 4294901760, %v4256_v31  ;;  %v9093_v14 = vand.u32 4294901760, %v3768_v46 }
 0x2aa   :  { %v3119_v17 = vadd.f32 %v9087_v47, %v3112_v34 }
 0x2ab   :  { %v9097_v49 = vsub.f32 %v4256_v31, %v9091_v40  ;;  %v3840_v39 = vsub.f32 %v3768_v46, %v9093_v14  ;;  %v4743_v3 = vld [vmem:[#allocation2 + $0x2] ss:$2 sm:$0xff] }
 0x2ac   :  { %v3120_v50 = vmax.f32 %v3119_v17, 0.0 }
 0x2ad   :  { %v4329_v8 = vand.u32 4294901760, %v9097_v49  ;;  %v3841_v32 = vand.u32 4294901760, %v3840_v39 }
 0x2ae   :  { %3121 = vxpose.xlu0.b32.start.end [1/1] (short) (narrow) %v3120_v50, 64 }
 0x2af   :  { %7335 = vmatmul.mubr.f32.vlgmr.msra.gmra.mrb[32].mxu0 %v4329_v8  ;;  %v3842_v61 = vsub.f32 %v3840_v39, %v3841_v32 }
 0x2b0   :  { %7877 = vmatpush3.bf16.msra.mxu0 %v8366_v62  ;;  %7356 = vmatprep.mubr.msk.f32.mxu0 %vm8059_vm1, %v9471_v48 }
 0x2b1   :  { %7878 = vmatprep.subr.bf16.mxu0 %v9472_v60  ;;  %v3843_v36 = vand.u32 4294901760, %v3842_v61 }
 0x2b3   :  { %7236 = vmatmul.mubr.f32.vlgmr.msra.gmra.mrb[40].mxu1 %v3843_v36 }
 0x2b4   :  { %7817 = vmatpush3.bf16.msra.mxu1 %v8354_v44  ;;  %7880 = vmatpush3.bf16.msra.mxu0 %v8368_v63  ;;  %v4745_v44 = vsel %vm657_vm3, %v4743_v3, 0 }
 0x2b5   :  { %7818 = vmatprep.subr.bf16.mxu1 %v9472_v60  ;;  %7887 = vmatprep.subr.bf16.mxu0 %v9472_v60 }
 0x2b6   :  { %7246 = vmatprep.mubr.msk.f32.mxu1 %vm8059_vm1, %v9471_v48 }
 0x2b7   :  { %7357 = vmatmul.mubr.f32.vlgmr.msra.gmra.mrb[34].mxu0 %v9091_v40 }
 0x2b8   :  { %7820 = vmatpush3.bf16.msra.mxu1 %v8356_v51  ;;  %7889 = vmatpush3.bf16.msra.mxu0 %v8432_v45  ;;  %v9125_v51 = vand.u32 4294901760, %v4745_v44 }
 0x2b9   :  { %7821 = vmatprep.subr.bf16.mxu1 %v9472_v60  ;;  %7890 = vmatprep.subr.bf16.mxu0 %v9472_v60 }
 0x2ba   :  { %7378 = vmatprep.mubr.msk.f32.mxu0 %vm8059_vm1, %v9471_v48  ;;  %v9134_v45 = vsub.f32 %v4745_v44, %v9125_v51 }
 0x2bb   :  { %7247 = vmatmul.mubr.f32.vlgmr.msra.gmra.mrb[42].mxu1 %v9093_v14 }
 0x2bc   :  { %7823 = vmatpush3.bf16.msra.mxu1 %v8358_v52  ;;  %7892 = vmatpush3.bf16.msra.mxu0 %v8440_v7  ;;  %v4818_v52 = vand.u32 4294901760, %v9134_v45 }
 0x2bd   :  { %7824 = vmatprep.subr.bf16.mxu1 %v9472_v60  ;;  %7899 = vmatprep.subr.bf16.mxu0 %v9472_v60 }
 0x2be   :  { %7257 = vmatprep.mubr.msk.f32.mxu1 %vm8059_vm1, %v9471_v48 }
 0x2bf   :  { %7379 = vmatmul.mubr.f32.vlgmr.msra.gmra.mrb[36].mxu0 %v9125_v51 }
 0x2c0   :  { %7826 = vmatpush3.bf16.msra.mxu1 %v8360_v53  ;;  %7901 = vmatpush3.bf16.msra.mxu0 %v9504_v54  ;;  %v5233_v53 = vld [vmem:[#allocation2 + $0x3] ss:$2 sm:$0xff] }
 0x2c1   :  { %7827 = vmatprep.subr.bf16.mxu1 %v9472_v60  ;;  %7902 = vmatprep.subr.bf16.mxu0 %v9472_v60 }
 0x2c2   :  { %7400 = vmatprep.mubr.msk.f32.mxu0 %vm8059_vm1, %v9471_v48 }
 0x2c3   :  { %7258 = vmatmul.mubr.f32.vlgmr.msra.gmra.mrb[44].mxu1 %v3840_v39 }
 0x2c4   :  { %7829 = vmatpush3.bf16.msra.mxu1 %v8338_v25  ;;  %7904 = vmatpush3.bf16.msra.mxu0 %v8572_v12 }
 0x2c5   :  { %7830 = vmatprep.subr.bf16.mxu1 %v9472_v60  ;;  %7911 = vmatprep.subr.bf16.mxu0 %v9472_v60 }
 0x2c6   :  { %7268 = vmatprep.mubr.msk.f32.mxu1 %vm8059_vm1, %v9471_v48 }
 0x2c7   :  { %7401 = vmatmul.mubr.f32.vlgmr.msra.gmra.mrb[38].mxu0 %v4818_v52 }
 0x2c8   :  { %7832 = vmatpush3.bf16.msra.mxu1 %v8350_v35  ;;  %7913 = vmatpush3.bf16.msra.mxu0 %v9504_v54 }
 0x2c9   :  { %7833 = vmatprep.subr.bf16.mxu1 %v9472_v60  ;;  %7914 = vmatprep.subr.bf16.mxu0 %v9472_v60 }
 0x2ca   :  { %7422 = vmatprep.mubr.msk.f32.mxu0 %vm8059_vm1, %v9471_v48 }
 0x2cb   :  { %7269 = vmatmul.mubr.f32.vlgmr.msra.gmra.mrb[46].mxu1 %v3841_v32 }
 0x2cc   :  { %7835 = vmatpush3.bf16.msra.mxu1 %v8362_v55  ;;  %7916 = vmatpush3.bf16.msra.mxu0 %v8572_v12  ;;  %v5235_v55 = vsel %vm657_vm3, %v5233_v53, 0 }
 0x2cd   :  { %7836 = vmatprep.subr.bf16.mxu1 %v9472_v60  ;;  %7923 = vmatprep.subr.bf16.mxu0 %v9472_v60 }
 0x2ce   :  { %7279 = vmatprep.mubr.msk.f32.mxu1 %vm8059_vm1, %v9471_v48 }
 0x2cf   :  { %7423 = vmatmul.mubr.f32.vlgmr.msra.gmra.mrb[40].mxu0 %v9125_v51 }
 0x2d0   :  { %7838 = vmatpush3.bf16.msra.mxu1 %v8364_v56  ;;  %7925 = vmatpush3.bf16.msra.mxu0 %v9509_v23  ;;  %v9173_v56 = vand.u32 4294901760, %v5235_v55  ;;  %v4819_v23 = vsub.f32 %v9134_v45, %v4818_v52 }
 0x2d1   :  { %7839 = vmatprep.subr.bf16.mxu1 %v9472_v60  ;;  %7926 = vmatprep.subr.bf16.mxu0 %v9472_v60 }
 0x2d2   :  { %7444 = vmatprep.mubr.msk.f32.mxu0 %vm8059_vm1, %v9471_v48  ;;  %v9182_v7 = vsub.f32 %v5235_v55, %v9173_v56 }
 0x2d3   :  { %7280 = vmatmul.mubr.f32.vlgmr.msra.gmra.mrb[48].mxu1 %v9093_v14 }
 0x2d4   :  { %7841 = vmatpush3.bf16.msra.mxu1 %v8338_v25  ;;  %7928 = vmatpush3.bf16.msra.mxu0 %v9510_v24  ;;  %v5308_v25 = vand.u32 4294901760, %v9182_v7  ;;  %v4820_v24 = vand.u32 4294901760, %v4819_v23 }
 0x2d5   :  { %7842 = vmatprep.subr.bf16.mxu1 %v9472_v60  ;;  %7935 = vmatprep.subr.bf16.mxu0 %v9472_v60 }
 0x2d6   :  { %7290 = vmatprep.mubr.msk.f32.mxu1 %vm8059_vm1, %v9471_v48 }
 0x2d7   :  { %7445 = vmatmul.mubr.f32.vlgmr.msra.gmra.mrb[42].mxu0 %v9173_v56 }
 0x2d8   :  { %7844 = vmatpush3.bf16.msra.mxu1 %v8350_v35  ;;  %7937 = vmatpush3.bf16.msra.mxu0 %v8683_v41  ;;  %v4330_v35 = vsub.f32 %v9097_v49, %v4329_v8 }
 0x2d9   :  { %7845 = vmatprep.subr.bf16.mxu1 %v9472_v60  ;;  %7938 = vmatprep.subr.bf16.mxu0 %v9472_v60 }
 0x2da   :  { %7466 = vmatprep.mubr.msk.f32.mxu0 %vm8059_vm1, %v9471_v48 }
 0x2db   :  { %7291 = vmatmul.mubr.f32.vlgmr.msra.gmra.mrb[50].mxu1 %v9093_v14 }
 0x2dc   :  { %7847 = vmatpush3.bf16.msra.mxu1 %v8366_v62  ;;  %7940 = vmatpush3.bf16.msra.mxu0 %v8697_v10  ;;  %v4331_v62 = vand.u32 4294901760, %v4330_v35 }
 0x2dd   :  { %7848 = vmatprep.subr.bf16.mxu1 %v9472_v60  ;;  %7947 = vmatprep.subr.bf16.mxu0 %v9472_v60 }
 0x2de   :  { %7301 = vmatprep.mubr.msk.f32.mxu1 %vm8059_vm1, %v9471_v48 }
 0x2df   :  { %7467 = vmatmul.mubr.f32.vlgmr.msra.gmra.mrb[44].mxu0 %v5308_v25 }
 0x2e0   :  { %7850 = vmatpush3.bf16.msra.mxu1 %v8368_v63  ;;  %7949 = vmatpush3.bf16.msra.mxu0 %v8683_v41  ;;  %v5723_v63 = vld [vmem:[#allocation2 + $0x4] ss:$2 sm:$0xff] }
 0x2e1   :  { %7851 = vmatprep.subr.bf16.mxu1 %v9472_v60  ;;  %7950 = vmatprep.subr.bf16.mxu0 %v9472_v60 }
 0x2e2   :  { %7488 = vmatprep.mubr.msk.f32.mxu0 %vm8059_vm1, %v9471_v48 }
 0x2e3   :  { %7302 = vmatmul.mubr.f32.vlgmr.msra.gmra.mrb[52].mxu1 %v4331_v62 }
 0x2e4   :  { %7853 = vmatpush3.bf16.msra.mxu1 %v8372_v22  ;;  %7952 = vmatpush3.bf16.msra.mxu0 %v8697_v10  ;;  %v5725_v22 = vsel %vm657_vm3, %v5723_v63, 0 }
 0x2e5   :  { %7854 = vmatprep.subr.bf16.mxu1 %v9472_v60  ;;  %7959 = vmatprep.subr.bf16.mxu0 %v9472_v60 }
 0x2e6   :  { %7312 = vmatprep.mubr.msk.f32.mxu1 %vm8059_vm1, %v9471_v48 }
 0x2e7   :  { %7489 = vmatmul.mubr.f32.vlgmr.msra.gmra.mrb[46].mxu0 %v9173_v56 }
 0x2e8   :  { %7856 = vmatpush3.bf16.msra.mxu1 %v8376_v29  ;;  %7961 = vmatpush3.bf16.msra.mxu0 %v8613_v57  ;;  %v9225_v29 = vand.u32 4294901760, %v5725_v22 }
 0x2e9   :  { %7857 = vmatprep.subr.bf16.mxu1 %v9472_v60  ;;  %7962 = vmatprep.subr.bf16.mxu0 %v9472_v60 }
 0x2ea   :  { %7510 = vmatprep.mubr.msk.f32.mxu0 %vm8059_vm1, %v9471_v48  ;;  %v9234_v57 = vsub.f32 %v5725_v22, %v9225_v29 }
 0x2eb   :  { %7313 = vmatmul.mubr.f32.vlgmr.msra.gmra.mrb[54].mxu1 %v9091_v40 }
 0x2ec   :  { %7859 = vmatpush3.bf16.msra.mxu1 %v8815_v37  ;;  %7964 = vmatpush3.bf16.msra.mxu0 %v8632_v59  ;;  %v9516_v59 = vld [vmem:[#allocation10_spill] sm:$0xff]  ;;  %v5798_v37 = vand.u32 4294901760, %v9234_v57 }
 0x2ed   :  { %7860 = vmatprep.subr.bf16.mxu1 %v9472_v60  ;;  %7971 = vmatprep.subr.bf16.mxu0 %v9472_v60 }
 0x2ee   :  { %7323 = vmatprep.mubr.msk.f32.mxu1 %vm8059_vm1, %v9471_v48 }
 0x2ef   :  { %7511 = vmatmul.mubr.f32.vlgmr.msra.gmra.mrb[48].mxu0 %v9225_v29 }
 0x2f0   :  { %7862 = vmatpush3.bf16.msra.mxu1 %v8834_v5  ;;  %7973 = vmatpush3.bf16.msra.mxu0 %v8772_v21  ;;  %v9517_v5 = vld [vmem:[#allocation11_spill] sm:$0xff] }
 0x2f1   :  { %7869 = vmatprep.subr.bf16.mxu1 %v9472_v60  ;;  %7974 = vmatprep.subr.bf16.mxu0 %v9472_v60 }
 0x2f2   :  { %7532 = vmatprep.mubr.msk.f32.mxu0 %vm8059_vm1, %v9471_v48 }
 0x2f3   :  { %7324 = vmatmul.mubr.f32.vlgmr.msra.gmra.mrb[56].mxu1 %v9097_v49 }
 0x2f4   :  { %7871 = vmatpush3.bf16.msra.mxu1 %v9516_v59  ;;  %7976 = vmatpush3.bf16.msra.mxu0 %v8789_v38 }
 0x2f5   :  { %7872 = vmatprep.subr.bf16.mxu1 %v9472_v60  ;;  %7983 = vmatprep.subr.bf16.mxu0 %v9472_v60 }
 0x2f6   :  { %7345 = vmatprep.mubr.msk.f32.mxu1 %vm8059_vm1, %v9471_v48 }
 0x2f7   :  { %7533 = vmatmul.mubr.f32.vlgmr.msra.gmra.mrb[50].mxu0 %v5798_v37 }
 0x2f8   :  { %7874 = vmatpush3.bf16.msra.mxu1 %v9517_v5  ;;  %7985 = vmatpush3.bf16.msra.mxu0 %v8772_v21 }
 0x2f9   :  { %7881 = vmatprep.subr.bf16.mxu1 %v9472_v60  ;;  %7986 = vmatprep.subr.bf16.mxu0 %v9472_v60 }
 0x2fa   :  { %7554 = vmatprep.mubr.msk.f32.mxu0 %vm8059_vm1, %v9471_v48 }
 0x2fb   :  { %7346 = vmatmul.mubr.f32.vlgmr.msra.gmra.mrb[58].mxu1 %v9091_v40 }
 0x2fc   :  { %7883 = vmatpush3.bf16.msra.mxu1 %v9504_v54  ;;  %7988 = vmatpush3.bf16.msra.mxu0 %v8789_v38 }
 0x2fd   :  { %7884 = vmatprep.subr.bf16.mxu1 %v9472_v60  ;;  %7367 = vmatprep.mubr.msk.f32.mxu1 %vm8059_vm1, %v9471_v48 }
 0x2ff   :  { %7555 = vmatmul.mubr.f32.vlgmr.msra.gmra.mrb[52].mxu0 %v9225_v29 }
 0x300   :  { %7886 = vmatpush3.bf16.msra.mxu1 %v8572_v12  ;;  %v5309_v12 = vsub.f32 %v9182_v7, %v5308_v25 }
 0x301   :  { %7893 = vmatprep.subr.bf16.mxu1 %v9472_v60 }
 0x303   :  { %7368 = vmatmul.mubr.f32.vlgmr.msra.gmra.mrb[60].mxu1 %v4820_v24 }
 0x304   :  { %7895 = vmatpush3.bf16.msra.mxu1 %v8627_v30  ;;  %7389 = vmatprep.mubr.msk.f32.mxu1 %vm8059_vm1, %v9471_v48  ;;  %v9518_v30 = vld [vmem:[#allocation16_spill] sm:$0xff] }
 0x305   :  { %7896 = vmatprep.subr.bf16.mxu1 %v9472_v60 }
 0x308   :  { %7898 = vmatpush3.bf16.msra.mxu1 %v8638_v33  ;;  %v5310_v33 = vand.u32 4294901760, %v5309_v12 }
 0x309   :  { %7905 = vmatprep.subr.bf16.mxu1 %v9472_v60 }
 0x30b   :  { %7390 = vmatmul.mubr.f32.vlgmr.msra.gmra.mrb[62].mxu1 %v9134_v45 }
 0x30c   :  { %7907 = vmatpush3.bf16.msra.mxu1 %v8652_v58  ;;  %7411 = vmatprep.mubr.msk.f32.mxu1 %vm8059_vm1, %v9471_v48  ;;  %v9519_v58 = vld [vmem:[#allocation17_spill] sm:$0xff] }
 0x30d   :  { %7908 = vmatprep.subr.bf16.mxu1 %v9472_v60 }
 0x310   :  { %7910 = vmatpush3.bf16.msra.mxu1 %v8667_v0  ;;  %v9520_v0 = vld [vmem:[#allocation18_spill] sm:$0xff] }
 0x311   :  { %7917 = vmatprep.subr.bf16.mxu1 %v9472_v60 }
 0x313   :  { %7412 = vmatmul.mubr.f32.vlgmr.msra.gmra.mrb[64].mxu1 %v9125_v51 }
 0x314   :  { %7919 = vmatpush3.bf16.msra.mxu1 %v8683_v41  ;;  %7433 = vmatprep.mubr.msk.f32.mxu1 %vm8059_vm1, %v9471_v48  ;;  %v9521_v41 = vld [vmem:[#allocation19_spill] sm:$0xff] }
 0x315   :  { %7920 = vmatprep.subr.bf16.mxu1 %v9472_v60 }
 0x318   :  { %7922 = vmatpush3.bf16.msra.mxu1 %v8697_v10  ;;  %v5799_v10 = vsub.f32 %v9234_v57, %v5798_v37 }
 0x319   :  { %7929 = vmatprep.subr.bf16.mxu1 %v9472_v60 }
 0x31a   :  { %v5800_v54 = vand.u32 4294901760, %v5799_v10 }
 0x31b   :  { %7434 = vmatmul.mubr.f32.vlgmr.msra.gmra.mrb[66].mxu1 %v5310_v33 }
 0x31c   :  { %7931 = vmatpush3.bf16.msra.mxu1 %v9518_v30  ;;  %7455 = vmatprep.mubr.msk.f32.mxu1 %vm8059_vm1, %v9471_v48 }
 0x31d   :  { %7932 = vmatprep.subr.bf16.mxu1 %v9472_v60 }
 0x320   :  { %7934 = vmatpush3.bf16.msra.mxu1 %v9519_v58 }
 0x321   :  { %7941 = vmatprep.subr.bf16.mxu1 %v9472_v60 }
 0x323   :  { %7456 = vmatmul.mubr.f32.vlgmr.msra.gmra.mrb[68].mxu1 %v9182_v7 }
 0x324   :  { %7943 = vmatpush3.bf16.msra.mxu1 %v9520_v0  ;;  %7477 = vmatprep.mubr.msk.f32.mxu1 %vm8059_vm1, %v9471_v48 }
 0x325   :  { %7944 = vmatprep.subr.bf16.mxu1 %v9472_v60 }
 0x328   :  { %7946 = vmatpush3.bf16.msra.mxu1 %v9521_v41 }
 0x329   :  { %7953 = vmatprep.subr.bf16.mxu1 %v9472_v60 }
 0x32b   :  { %7478 = vmatmul.mubr.f32.vlgmr.msra.gmra.mrb[70].mxu1 %v9173_v56 }
 0x32c   :  { %7955 = vmatpush3.bf16.msra.mxu1 %v8772_v21  ;;  %7499 = vmatprep.mubr.msk.f32.mxu1 %vm8059_vm1, %v9471_v48  ;;  %v9523_v21 = vld [vmem:[#allocation21_spill] sm:$0xff] }
 0x32d   :  { %7956 = vmatprep.subr.bf16.mxu1 %v9472_v60 }
 0x32e   :  { %v3137_v46 = vpop.trf.xlu0 }
 0x32f   :  { %3154 = vst.msk [vmem:[%s9402_s5] sm:$0xff] %vm3153_vm4, %v3137_v46 }
 0x330   :  { %7958 = vmatpush3.bf16.msra.mxu1 %v8789_v38  ;;  %v9525_v38 = vld [vmem:[#allocation23_spill] sm:$0xff] }
 0x331   :  { %7965 = vmatprep.subr.bf16.mxu1 %v9472_v60 }
 0x332   :  { %v3138_v17 = vpop.trf.xlu0 }
 0x333   :  { %7500 = vmatmul.mubr.f32.vlgmr.msra.gmra.mrb[72].mxu1 %v5800_v54  ;;  %3155 = vst.msk [vmem:[%s9402_s5 + $0x8] sm:$0xff] %vm3153_vm4, %v3138_v17 }
 0x334   :  { %7967 = vmatpush3.bf16.msra.mxu1 %v9522_v18  ;;  %7521 = vmatprep.mubr.msk.f32.mxu1 %vm8059_vm1, %v9471_v48 }
 0x335   :  { %7968 = vmatprep.subr.bf16.mxu1 %v9472_v60 }
 0x336   :  { %v3139_v8 = vpop.trf.xlu0 }
 0x337   :  { %3156 = vst.msk [vmem:[%s9402_s5 + $0x10] sm:$0xff] %vm3153_vm4, %v3139_v8 }
 0x338   :  { %7970 = vmatpush3.bf16.msra.mxu1 %v9523_v21 }
 0x339   :  { %7977 = vmatprep.subr.bf16.mxu1 %v9472_v60 }
 0x33a   :  { %v3140_v36 = vpop.trf.xlu0 }
 0x33b   :  { %7522 = vmatmul.mubr.f32.vlgmr.msra.gmra.mrb[74].mxu1 %v9234_v57  ;;  %3157 = vst.msk [vmem:[%s9402_s5 + $0x18] sm:$0xff] %vm3153_vm4, %v3140_v36 }
 0x33c   :  { %7979 = vmatpush3.bf16.msra.mxu1 %v9524_v27  ;;  %7543 = vmatprep.mubr.msk.f32.mxu1 %vm8059_vm1, %v9471_v48 }
 0x33d   :  { %7980 = vmatprep.subr.bf16.mxu1 %v9472_v60 }
 0x33e   :  { %v3141_v45 = vpop.trf.xlu0 }
 0x33f   :  { %3158 = vst.msk [vmem:[%s9402_s5 + $0x20] sm:$0xff] %vm3153_vm4, %v3141_v45 }
 0x340   :  { %7982 = vmatpush3.bf16.msra.mxu1 %v9525_v38 }
 0x342   :  { %v3142_v55 = vpop.trf.xlu0 }
 0x343   :  { %7544 = vmatmul.mubr.f32.vlgmr.msra.gmra.mrb[76].mxu1 %v9225_v29  ;;  %3159 = vst.msk [vmem:[%s9402_s5 + $0x28] sm:$0xff] %vm3153_vm4, %v3142_v55 }
 0x346   :  { %v3143_v35 = vpop.trf.xlu0 }
 0x347   :  { %3160 = vst.msk [vmem:[%s9402_s5 + $0x30] sm:$0xff] %vm3153_vm4, %v3143_v35 }
 0x34a   :  { %v3144_v22 = vpop.trf.xlu0 }
 0x34b   :  { %3161 = vst.msk [vmem:[%s9402_s5 + $0x38] sm:$0xff] %vm3153_vm4, %v3144_v22 }
 0x382   :  { %v4581_v19 = vpop.f32.mrb[32].mxu0 }
 0x383   :  { %v7336_v28 = vpop.f32.mrb[33].mxu0 }
 0x386   :  { %v3845_v1 = vpop.f32.mrb[40].mxu1 }
 0x387   :  { %v7237_v11 = vpop.f32.mrb[41].mxu1 }
 0x38a   :  { %v9323_v43 = vpop.f32.mrb[34].mxu0 }
 0x38b   :  { %v7358_v9 = vpop.f32.mrb[35].mxu0 }
 0x38e   :  { %v3936_v26 = vpop.f32.mrb[42].mxu1 }
 0x38f   :  { %v3937_v2 = vadd.f32 %v3936_v26, %v3845_v1  ;;  %v7248_v42 = vpop.f32.mrb[43].mxu1 }
 0x392   :  { %v9325_v4 = vpop.f32.mrb[36].mxu0 }
 0x393   :  { %v7380_v16 = vpop.f32.mrb[37].mxu0 }
 0x396   :  { %v4016_v48 = vpop.f32.mrb[44].mxu1 }
 0x397   :  { %v4017_v13 = vadd.f32 %v4016_v48, %v3937_v2  ;;  %v7259_v60 = vpop.f32.mrb[45].mxu1 }
 0x39a   :  { %v9327_v15 = vpop.f32.mrb[38].mxu0 }
 0x39b   :  { %v7402_v20 = vpop.f32.mrb[39].mxu0 }
 0x39e   :  { %v4093_v6 = vpop.f32.mrb[46].mxu1 }
 0x39f   :  { %v4094_v34 = vadd.f32 %v4093_v6, %v4017_v13  ;;  %v7270_v31 = vpop.f32.mrb[47].mxu1 }
 0x3a2   :  { %v5228_v40 = vpop.f32.mrb[40].mxu0 }
 0x3a3   :  { %v7424_v14 = vpop.f32.mrb[41].mxu0 }
 0x3a6   :  { %v4176_v49 = vpop.f32.mrb[48].mxu1 }
 0x3a7   :  { %v4177_v39 = vadd.f32 %v4176_v49, %v4094_v34  ;;  %v7281_v50 = vpop.f32.mrb[49].mxu1 }
 0x3aa   :  { %v5403_v32 = vpop.f32.mrb[42].mxu0 }
 0x3ab   :  { %v7446_v61 = vpop.f32.mrb[43].mxu0 }
 0x3ae   :  { %v4251_v3 = vpop.f32.mrb[50].mxu1 }
 0x3af   :  { %v4252_v44 = vadd.f32 %v4251_v3, %v4177_v39  ;;  %v7292_v51 = vpop.f32.mrb[51].mxu1 }
 0x3b2   :  { %v5560_v52 = vpop.f32.mrb[44].mxu0 }
 0x3b3   :  { %v7468_v53 = vpop.f32.mrb[45].mxu0 }
 0x3b6   :  { %v4333_v56 = vpop.f32.mrb[52].mxu1 }
 0x3b7   :  { %v4334_v7 = vadd.f32 %v4333_v56, %v4252_v44  ;;  %v7303_v25 = vpop.f32.mrb[53].mxu1 }
 0x3ba   :  { %v5718_v62 = vpop.f32.mrb[46].mxu0 }
 0x3bb   :  { %v7490_v63 = vpop.f32.mrb[47].mxu0 }
 0x3be   :  { %v4424_v29 = vpop.f32.mrb[54].mxu1 }
 0x3bf   :  { %v4425_v57 = vadd.f32 %v4424_v29, %v4334_v7  ;;  %v7314_v59 = vpop.f32.mrb[55].mxu1 }
 0x3c2   :  { %v5893_v37 = vpop.f32.mrb[48].mxu0 }
 0x3c3   :  { %v7512_v5 = vpop.f32.mrb[49].mxu0 }
 0x3c6   :  { %v4504_v23 = vpop.f32.mrb[56].mxu1 }
 0x3c7   :  { %v4505_v24 = vadd.f32 %v4504_v23, %v4425_v57  ;;  %v7325_v12 = vpop.f32.mrb[57].mxu1 }
 0x3c9   :  { %v4582_v33 = vadd.f32 %v4581_v19, %v4505_v24 }
 0x3ca   :  { %v6050_v30 = vpop.f32.mrb[50].mxu0 }
 0x3cb   :  { %v7534_v58 = vpop.f32.mrb[51].mxu0 }
 0x3ce   :  { %v4664_v0 = vpop.f32.mrb[58].mxu1 }
 0x3cf   :  { %v4665_v41 = vadd.f32 %v4664_v0, %v4582_v33  ;;  %v7347_v10 = vpop.f32.mrb[59].mxu1 }
 0x3d1   :  { %v4740_v54 = vadd.f32 %v9323_v43, %v4665_v41 }
 0x3d2   :  { %v6208_v18 = vpop.f32.mrb[52].mxu0 }
 0x3d3   :  { %v7556_v21 = vpop.f32.mrb[53].mxu0 }
 0x3d6   :  { %v4822_v27 = vpop.f32.mrb[60].mxu1 }
 0x3d7   :  { %v4914_v38 = vadd.f32 %v9325_v4, %v4822_v27  ;;  %v7369_v28 = vpop.f32.mrb[61].mxu1 }
 0x3de   :  { %v4993_v1 = vpop.f32.mrb[62].mxu1 }
 0x3df   :  { %v4994_v11 = vadd.f32 %v4993_v1, %v4914_v38  ;;  %v7391_v9 = vpop.f32.mrb[63].mxu1 }
 0x3e1   :  { %v5071_v26 = vadd.f32 %v9327_v15, %v4994_v11 }
 0x3e6   :  { %v5153_v2 = vpop.f32.mrb[64].mxu1 }
 0x3e7   :  { %v5154_v19 = vadd.f32 %v5153_v2, %v5071_v26  ;;  %v7413_v42 = vpop.f32.mrb[65].mxu1 }
 0x3e9   :  { %v5229_v16 = vadd.f32 %v5228_v40, %v5154_v19 }
 0x3eb   :  { %v5232_v48 = vadd.f32 %v5229_v16, %v4740_v54 }
 0x3ee   :  { %v5312_v13 = vpop.f32.mrb[66].mxu1 }
 0x3ef   :  { %v5404_v60 = vadd.f32 %v5403_v32, %v5312_v13  ;;  %v7435_v20 = vpop.f32.mrb[67].mxu1 }
 0x3f6   :  { %v5483_v43 = vpop.f32.mrb[68].mxu1 }
 0x3f7   :  { %v5484_v6 = vadd.f32 %v5483_v43, %v5404_v60  ;;  %v7457_v34 = vpop.f32.mrb[69].mxu1 }
 0x3f9   :  { %v5561_v31 = vadd.f32 %v5560_v52, %v5484_v6 }
 0x3fe   :  { %v5643_v46 = vpop.f32.mrb[70].mxu1 }
 0x3ff   :  { %v5644_v4 = vadd.f32 %v5643_v46, %v5561_v31  ;;  %v7479_v14 = vpop.f32.mrb[71].mxu1 }
 0x401   :  { %v5719_v17 = vadd.f32 %v5718_v62, %v5644_v4 }
 0x403   :  { %v5722_v49 = vadd.f32 %v5719_v17, %v5232_v48 }
 0x406   :  { %v5802_v39 = vpop.f32.mrb[72].mxu1 }
 0x407   :  { %v5894_v50 = vadd.f32 %v5893_v37, %v5802_v39  ;;  %v7501_v15 = vpop.f32.mrb[73].mxu1 }
 0x40e   :  { %v5973_v8 = vpop.f32.mrb[74].mxu1 }
 0x40f   :  { %v5974_v61 = vadd.f32 %v5973_v8, %v5894_v50  ;;  %v7523_v36 = vpop.f32.mrb[75].mxu1 }
 0x411   :  { %v6051_v40 = vadd.f32 %v6050_v30, %v5974_v61 }
 0x416   :  { %v6133_v3 = vpop.f32.mrb[76].mxu1 }
 0x417   :  { %v6134_v44 = vadd.f32 %v6133_v3, %v6051_v40  ;;  %v7545_v32 = vpop.f32.mrb[77].mxu1 }
 0x419   :  { %v6209_v51 = vadd.f32 %v6208_v18, %v6134_v44 }
 0x41b   :  { %v6212_v45 = vadd.f32 %v6209_v51, %v5722_v49 }
 0x41d   :  { %v6213_v53 = vadd.f32 %v9087_v47, %v6212_v45 }
 0x41f   :  { %v6214_v52 = vmax.f32 %v6213_v53, 0.0 }
 0x421   :  { %6215 = vxpose.xlu0.b32.start.end [1/1] (short) (narrow) %v6214_v52, 64 }
 0x4a1   :  { %v6231_v55 = vpop.trf.xlu0 }
 0x4a2   :  { %6265 = vst.msk [vmem:[%s9402_s5 + $0x40] sm:$0xff] %vm3153_vm4, %v6231_v55 }
 0x4a5   :  { %v6232_v56 = vpop.trf.xlu0 }
 0x4a6   :  { %6266 = vst.msk [vmem:[%s9402_s5 + $0x48] sm:$0xff] %vm3153_vm4, %v6232_v56 }
 0x4a9   :  { %v6233_v7 = vpop.trf.xlu0 }
 0x4aa   :  { %6267 = vst.msk [vmem:[%s9402_s5 + $0x50] sm:$0xff] %vm3153_vm4, %v6233_v7 }
 0x4ad   :  { %v6234_v47 = vpop.trf.xlu0 }
 0x4ae   :  { %6268 = vst.msk [vmem:[%s9402_s5 + $0x58] sm:$0xff] %vm3153_vm4, %v6234_v47 }
 0x4b1   :  { %v6235_v25 = vpop.trf.xlu0 }
 0x4b2   :  { %6269 = vst.msk [vmem:[%s9402_s5 + $0x60] sm:$0xff] %vm3153_vm4, %v6235_v25 }
 0x4b5   :  { %v6236_v35 = vpop.trf.xlu0 }
 0x4b6   :  { %6270 = vst.msk [vmem:[%s9402_s5 + $0x68] sm:$0xff] %vm3153_vm4, %v6236_v35 }
 0x4b9   :  { %v6237_v62 = vpop.trf.xlu0 }
 0x4ba   :  { %6271 = vst.msk [vmem:[%s9402_s5 + $0x70] sm:$0xff] %vm3153_vm4, %v6237_v62 }
 0x4bd   :  { %v6238_v63 = vpop.trf.xlu0 }
 0x4be   :  { %6272 = vst.msk [vmem:[%s9402_s5 + $0x78] sm:$0xff] %vm3153_vm4, %v6238_v63 }

</bundles_post_ra>
